<compile_context>
chip_gen: v7x
topology: tpu7x:2x2x1
jax: 0.10.0
libtpu: 0.0.40
codegen_flags: <defaults>
</compile_context>

<pallas_src>
import math

import jax
import jax.numpy as jnp
from jax import lax
from jax.experimental import pallas as pl
from jax.experimental.pallas import tpu as pltpu

# ---- module-consistent configuration ---------------------------------------
B = 2          # batch
S = 8          # lookback_window (sequence length)
F = 16         # n_features
D = 32         # d_model
P = 4          # n_dependent_variables
L = 3          # num encoder layers
NHEAD = 2
HD = D // NHEAD
FF = 4 * D     # dim_feedforward
EPS = 1e-5     # nn.LayerNorm default eps
VOUT = 128     # lane-padded width of the final store
OUT_ROWS = 8   # sublane-padded rows of the final store

# ---- big per-layer weight slab: (L, D, BIGW_LANES) bf16 ---------------------
COL_QKV = 0      # [  0:128) fused QKV weight (Q cols pre-scaled; lanes 96:128 zero)
COL_W1 = 128     # [128:256) FFN linear1 weight (D, FF)
COL_W2T = 256    # [256:384) FFN linear2 weight, transposed to (D, FF)
COL_WO = 384     # [384:416) attention out-projection weight (D, D)
BIGW_LANES = 416

# ---- misc weight slab: (D, MISC_LANES) bf16 ---------------------------------
MCOL_WH2 = 0     # [  0:128) head linear2 weight, out-lanes padded to 128
MCOL_WIN = 128   # [128:160) input-projection weight (rows 0:F)
MCOL_WH1 = 160   # [160:192) head linear1 weight
MISC_LANES = 192

# ---- packed small-vector table: (VROWS, 128) f32 ----------------------------
ROW_BIN = 0                                   # input-projection bias
ROW_LAYER0 = 1
ROWS_PER_LAYER = 8                            # [bqkv(pad128), bo, b1, b2, ln1w, ln1b, ln2w, ln2b]
ROW_BH1 = ROW_LAYER0 + L * ROWS_PER_LAYER     # head linear1 bias
ROW_BH2 = ROW_BH1 + 1                         # head linear2 bias (padded to 128)
VROWS = 32


def _layer_norm(x, gamma, beta):
    # var = E[x^2] - mu^2: the two lane-reductions are independent (XLU overlap).
    mu = jnp.mean(x, axis=-1, keepdims=True)
    msq = jnp.mean(x * x, axis=-1, keepdims=True)
    var = msq - mu * mu
    return (x - mu) * lax.rsqrt(var + EPS) * gamma + beta


def _softmax(s):
    s = s - jnp.max(s, axis=-1, keepdims=True)
    e = jnp.exp(s)
    # EUP-side approximate reciprocal instead of a VALU divide.
    return e * pl.reciprocal(jnp.sum(e, axis=-1, keepdims=True), approx=True)


def _gelu_exact(x):
    # PyTorch nn.GELU default is the exact erf form; erf built from the
    # Abramowitz & Stegun 7.1.26 rational approximation (|err| < 1.5e-7).
    z = x * 0.7071067811865476
    az = jnp.abs(z)
    t = 1.0 / (1.0 + 0.3275911 * az)
    poly = t * (0.254829592 + t * (-0.284496736 + t * (1.421413741
            + t * (-1.453152027 + t * 1.061405429))))
    erf_abs = 1.0 - poly * jnp.exp(-az * az)
    erf_z = jnp.where(z >= 0.0, erf_abs, -erf_abs)
    return 0.5 * x * (1.0 + erf_z)


def transformer_kernel(x_ref, bigw_ref, misc_ref, vecs_ref, out_ref):
    x = x_ref[...]                                               # (B*S, F) f32
    mw = misc_ref[...]                                           # (D, 192) bf16
    vt = vecs_ref[...]                                           # (32, 128) f32

    # input_projection (Linear); PositionalEncoding.forward is an identity.
    w_in = mw[0:F, MCOL_WIN:MCOL_WIN + D]                        # (F, D) bf16
    h = jnp.dot(x.astype(jnp.bfloat16), w_in,
                preferred_element_type=jnp.float32) + vt[ROW_BIN:ROW_BIN + 1, :D]

    for l in range(L):                                           # static unroll
        base = ROW_LAYER0 + l * ROWS_PER_LAYER
        wl = bigw_ref[l]                                         # (D, 416) bf16
        bqkv = vt[base + 0:base + 1, :]        # 128-wide (lanes 96:128 are zero)
        bo = vt[base + 1:base + 2, :D]
        b1 = vt[base + 2:base + 3, :]          # 128-wide == FF
        b2 = vt[base + 3:base + 4, :D]
        ln1w = vt[base + 4:base + 5, :D]
        ln1b = vt[base + 5:base + 6, :D]
        ln2w = vt[base + 6:base + 7, :D]
        ln2b = vt[base + 7:base + 8, :D]

        # ----- multi-head self-attention (post-norm encoder layer) -----
        # 1/sqrt(HD) already folded into the Q columns at pack time.
        qkv = jnp.dot(h.astype(jnp.bfloat16), wl[:, COL_QKV:COL_QKV + 128],
                      preferred_element_type=jnp.float32) + bqkv   # (B*S, 128)
        qkv3 = qkv.reshape(B, S, 128)

        heads = []
        for hh in range(NHEAD):                                  # NHEAD = 2
            qh = qkv3[:, :, hh * HD:(hh + 1) * HD].astype(jnp.bfloat16)
            kh = qkv3[:, :, D + hh * HD:D + (hh + 1) * HD].astype(jnp.bfloat16)
            vh = qkv3[:, :, 2 * D + hh * HD:2 * D + (hh + 1) * HD].astype(jnp.bfloat16)
            scores = jnp.einsum('bqd,bkd->bqk', qh, kh,
                                preferred_element_type=jnp.float32)  # (B, S, S)
            probs = _softmax(scores).astype(jnp.bfloat16)
            heads.append(jnp.einsum('bqk,bkd->bqd', probs, vh,
                                    preferred_element_type=jnp.float32))
        attn = jnp.concatenate(heads, axis=-1).reshape(B * S, D)
        attn = jnp.dot(attn.astype(jnp.bfloat16), wl[:, COL_WO:COL_WO + D],
                       preferred_element_type=jnp.float32) + bo
        h = _layer_norm(h + attn, ln1w, ln1b)

        # ----- feed-forward (ReLU, dropout = identity) -----
        ff = jnp.dot(h.astype(jnp.bfloat16), wl[:, COL_W1:COL_W1 + FF],
                     preferred_element_type=jnp.float32) + b1
        ff = jnp.maximum(ff, 0.0).astype(jnp.bfloat16)
        # Linear2 via pre-transposed weight: contract last dims (like Q @ K^T).
        ff2 = lax.dot_general(ff, wl[:, COL_W2T:COL_W2T + FF],
                              dimension_numbers=(((1,), (1,)), ((), ())),
                              preferred_element_type=jnp.float32) + b2
        h = _layer_norm(h + ff2, ln2w, ln2b)

    # output.mean(dim=1): per-sequence sublane reduction (no MXU op in the tail).
    seq_rows = [jnp.sum(h[b * S:(b + 1) * S, :], axis=0, keepdims=True)
                for b in range(B)]
    seq_repr = jnp.concatenate(seq_rows, axis=0) * (1.0 / S)      # (B, D) f32

    # head: Linear -> GELU(exact) -> Linear (lane-padded to VOUT columns)
    g = jnp.dot(seq_repr.astype(jnp.bfloat16), mw[:, MCOL_WH1:MCOL_WH1 + D],
                preferred_element_type=jnp.float32) + vt[ROW_BH1:ROW_BH1 + 1, :D]
    g = _gelu_exact(g)
    pred = jnp.dot(g.astype(jnp.bfloat16), mw[:, MCOL_WH2:MCOL_WH2 + VOUT],
                   preferred_element_type=jnp.float32) + vt[ROW_BH2:ROW_BH2 + 1, :]

    # Pad to a full (8, 128) slab so the final store is unmasked (v5e-friendly).
    pad = jnp.zeros((OUT_ROWS - B, VOUT), jnp.float32)
    out_ref[...] = jnp.concatenate([pred, pad], axis=0)


def transformer_forward(src, packed):
    big_w, misc_w, vecs = packed
    src2 = src.reshape(B * S, F)                 # layout-preserving, free

    vmem = pl.BlockSpec(memory_space=pltpu.MemorySpace.VMEM)
    out = pl.pallas_call(
        transformer_kernel,
        out_shape=jax.ShapeDtypeStruct((OUT_ROWS, VOUT), jnp.float32),
        in_specs=[vmem, vmem, vmem, vmem],
        out_specs=vmem,
    )(src2, big_w, misc_w, vecs)
    return out[:B, :P]                           # (B, P)


def init_params(key):
    keys = jax.random.split(key, 14)

    def nrm(k, shape, scale=0.05):
        return (scale * jax.random.normal(k, shape)).astype(jnp.float32)

    w_in = nrm(keys[0], (F, D))
    b_in = nrm(keys[1], (1, D))
    wqkv = nrm(keys[2], (L, D, 3 * D))
    bqkv = nrm(keys[3], (L, 1, 3 * D))
    wo = nrm(keys[4], (L, D, D))
    bo = nrm(keys[5], (L, 1, D))
    w1 = nrm(keys[6], (L, D, FF))
    b1 = nrm(keys[7], (L, 1, FF))
    w2 = nrm(keys[8], (L, FF, D))
    b2 = nrm(keys[9], (L, 1, D))
    ln1w = jnp.ones((L, 1, D), jnp.float32)
    ln1b = jnp.zeros((L, 1, D), jnp.float32)
    ln2w = jnp.ones((L, 1, D), jnp.float32)
    ln2b = jnp.zeros((L, 1, D), jnp.float32)
    wh1 = nrm(keys[10], (D, D))
    bh1 = nrm(keys[11], (1, D))
    wh2 = nrm(keys[12], (D, P))
    bh2 = nrm(keys[13], (1, P))
    return (w_in, b_in, wqkv, bqkv, wo, bo, w1, b1, w2, b2,
            ln1w, ln1b, ln2w, ln2b, wh1, bh1, wh2, bh2)


def pack_params(params):
    """One-time host-side prep: fold the attention scale into Q, pre-transpose
    the FFN linear2 weight, pack all big weights into two lane-dense bf16 slabs
    and all small vectors into one f32 table."""
    (w_in, b_in, wqkv, bqkv, wo, bo, w1, b1, w2, b2,
     ln1w, ln1b, ln2w, ln2b, wh1, bh1, wh2, bh2) = params

    scale = 1.0 / math.sqrt(HD)
    wqkv_s = wqkv.at[:, :, :D].multiply(scale)       # fold 1/sqrt(HD) into Q cols
    bqkv_s = bqkv.at[:, :, :D].multiply(scale)

    # Per-layer fused weight slab (bf16): [QKV | W1 | W2^T | Wo].
    big = jnp.zeros((L, D, BIGW_LANES), jnp.float32)
    big = big.at[:, :, COL_QKV:COL_QKV + 3 * D].set(wqkv_s)
    big = big.at[:, :, COL_W1:COL_W1 + FF].set(w1)
    big = big.at[:, :, COL_W2T:COL_W2T + FF].set(jnp.swapaxes(w2, 1, 2))
    big = big.at[:, :, COL_WO:COL_WO + D].set(wo)
    big_w = big.astype(jnp.bfloat16)

    # Misc weight slab (bf16): [Wh2 padded | Win | Wh1].
    misc = jnp.zeros((D, MISC_LANES), jnp.float32)
    misc = misc.at[:, MCOL_WH2:MCOL_WH2 + P].set(wh2)
    misc = misc.at[0:F, MCOL_WIN:MCOL_WIN + D].set(w_in)
    misc = misc.at[:, MCOL_WH1:MCOL_WH1 + D].set(wh1)
    misc_w = misc.astype(jnp.bfloat16)

    # Small-vector table (f32): biases + LayerNorm affine params.
    vecs = jnp.zeros((VROWS, 128), jnp.float32)
    vecs = vecs.at[ROW_BIN, :D].set(b_in[0])
    for l in range(L):
        base = ROW_LAYER0 + l * ROWS_PER_LAYER
        vecs = vecs.at[base + 0, :3 * D].set(bqkv_s[l, 0])
        vecs = vecs.at[base + 1, :D].set(bo[l, 0])
        vecs = vecs.at[base + 2, :FF].set(b1[l, 0])
        vecs = vecs.at[base + 3, :D].set(b2[l, 0])
        vecs = vecs.at[base + 4, :D].set(ln1w[l, 0])
        vecs = vecs.at[base + 5, :D].set(ln1b[l, 0])
        vecs = vecs.at[base + 6, :D].set(ln2w[l, 0])
        vecs = vecs.at[base + 7, :D].set(ln2b[l, 0])
    vecs = vecs.at[ROW_BH1, :D].set(bh1[0])
    vecs = vecs.at[ROW_BH2, :P].set(bh2[0])

    return (big_w, misc_w, vecs)


if __name__ == "__main__":
    root = jax.random.PRNGKey(0)
    k_x, k_p = jax.random.split(root)
    src = jax.random.normal(k_x, (B, S, F), dtype=jnp.float32)  # (batch, seq, n_features)
    params = init_params(k_p)
    packed = pack_params(params)                                 # one-time prep

    pred = transformer_forward(src, packed)
    jax.block_until_ready(pred)
    assert pred.shape == (B, P) and pred.dtype == jnp.float32
    assert bool(jnp.all(jnp.isfinite(pred)))
    print("KERNEL_OK")
</pallas_src>

<mosaic_0001>
module attributes {stable_mosaic.version = 11 : i64} {
  func.func @transformer_kernel(%arg0: memref<16x16xf32, #tpu.memory_space<vmem>>, %arg1: memref<3x32x416xbf16, #tpu.memory_space<vmem>>, %arg2: memref<32x192xbf16, #tpu.memory_space<vmem>>, %arg3: memref<32x128xf32, #tpu.memory_space<vmem>>, %arg4: memref<8x128xf32, #tpu.memory_space<vmem>>) attributes {dimension_semantics = [], scalar_prefetch = 0 : i64, scratch_operands = 0 : i64, tpu.core_type = #tpu.core_type<tc>} {
    %c0 = arith.constant 0 : index
    %c0_0 = arith.constant 0 : index
    %0 = vector.load %arg0[%c0, %c0_0] : memref<16x16xf32, #tpu.memory_space<vmem>>, vector<16x16xf32>
    %c0_1 = arith.constant 0 : index
    %c0_2 = arith.constant 0 : index
    %1 = vector.load %arg2[%c0_1, %c0_2] : memref<32x192xbf16, #tpu.memory_space<vmem>>, vector<32x192xbf16>
    %c0_3 = arith.constant 0 : index
    %c0_4 = arith.constant 0 : index
    %2 = vector.load %arg3[%c0_3, %c0_4] : memref<32x128xf32, #tpu.memory_space<vmem>>, vector<32x128xf32>
    %3 = vector.extract_strided_slice %1 {offsets = [0, 128], sizes = [16, 32], strides = [1, 1]} : vector<32x192xbf16> to vector<16x32xbf16>
    %4 = arith.truncf %0 : vector<16x16xf32> to vector<16x16xbf16>
    %cst = arith.constant dense<0.000000e+00> : vector<16x32xf32>
    %5 = tpu.matmul %4, %3, %cst {dimension_numbers = #tpu.dot_dimension_numbers<[1], [0], [0], [1], [0, 0, 1, 1], [], []>} : vector<16x16xbf16>, vector<16x32xbf16>, vector<16x32xf32> -> vector<16x32xf32>
    %6 = vector.extract_strided_slice %2 {offsets = [0, 0], sizes = [1, 32], strides = [1, 1]} : vector<32x128xf32> to vector<1x32xf32>
    %7 = vector.broadcast %6 : vector<1x32xf32> to vector<16x32xf32>
    %8 = arith.addf %5, %7 : vector<16x32xf32>
    %c0_5 = arith.constant 0 : index
    %c0_6 = arith.constant 0 : index
    %c0_7 = arith.constant 0 : index
    %9 = vector.load %arg1[%c0_5, %c0_6, %c0_7] : memref<3x32x416xbf16, #tpu.memory_space<vmem>>, vector<1x32x416xbf16>
    %10 = vector.shape_cast %9 : vector<1x32x416xbf16> to vector<32x416xbf16>
    %11 = vector.extract_strided_slice %2 {offsets = [1, 0], sizes = [1, 128], strides = [1, 1]} : vector<32x128xf32> to vector<1x128xf32>
    %12 = vector.extract_strided_slice %2 {offsets = [2, 0], sizes = [1, 32], strides = [1, 1]} : vector<32x128xf32> to vector<1x32xf32>
    %13 = vector.extract_strided_slice %2 {offsets = [3, 0], sizes = [1, 128], strides = [1, 1]} : vector<32x128xf32> to vector<1x128xf32>
    %14 = vector.extract_strided_slice %2 {offsets = [4, 0], sizes = [1, 32], strides = [1, 1]} : vector<32x128xf32> to vector<1x32xf32>
    %15 = vector.extract_strided_slice %2 {offsets = [5, 0], sizes = [1, 32], strides = [1, 1]} : vector<32x128xf32> to vector<1x32xf32>
    %16 = vector.extract_strided_slice %2 {offsets = [6, 0], sizes = [1, 32], strides = [1, 1]} : vector<32x128xf32> to vector<1x32xf32>
    %17 = vector.extract_strided_slice %2 {offsets = [7, 0], sizes = [1, 32], strides = [1, 1]} : vector<32x128xf32> to vector<1x32xf32>
    %18 = vector.extract_strided_slice %2 {offsets = [8, 0], sizes = [1, 32], strides = [1, 1]} : vector<32x128xf32> to vector<1x32xf32>
    %19 = arith.truncf %8 : vector<16x32xf32> to vector<16x32xbf16>
    %20 = vector.extract_strided_slice %10 {offsets = [0, 0], sizes = [32, 128], strides = [1, 1]} : vector<32x416xbf16> to vector<32x128xbf16>
    %cst_8 = arith.constant dense<0.000000e+00> : vector<16x128xf32>
    %21 = tpu.matmul %19, %20, %cst_8 {dimension_numbers = #tpu.dot_dimension_numbers<[1], [0], [0], [1], [0, 0, 1, 1], [], []>} : vector<16x32xbf16>, vector<32x128xbf16>, vector<16x128xf32> -> vector<16x128xf32>
    %22 = vector.broadcast %11 : vector<1x128xf32> to vector<16x128xf32>
    %23 = arith.addf %21, %22 : vector<16x128xf32>
    %24 = vector.shape_cast %23 : vector<16x128xf32> to vector<2x8x128xf32>
    %25 = vector.extract_strided_slice %24 {offsets = [0, 0, 0], sizes = [2, 8, 16], strides = [1, 1, 1]} : vector<2x8x128xf32> to vector<2x8x16xf32>
    %26 = arith.truncf %25 : vector<2x8x16xf32> to vector<2x8x16xbf16>
    %27 = vector.extract_strided_slice %24 {offsets = [0, 0, 32], sizes = [2, 8, 16], strides = [1, 1, 1]} : vector<2x8x128xf32> to vector<2x8x16xf32>
    %28 = arith.truncf %27 : vector<2x8x16xf32> to vector<2x8x16xbf16>
    %29 = vector.extract_strided_slice %24 {offsets = [0, 0, 64], sizes = [2, 8, 16], strides = [1, 1, 1]} : vector<2x8x128xf32> to vector<2x8x16xf32>
    %30 = arith.truncf %29 : vector<2x8x16xf32> to vector<2x8x16xbf16>
    "tpu.trace_start"() <{level = 10 : i32, message = "bqd,bkd->bqk"}> : () -> ()
    %cst_9 = arith.constant dense<0.000000e+00> : vector<2x8x8xf32>
    %31 = tpu.matmul %26, %28, %cst_9 {dimension_numbers = #tpu.dot_dimension_numbers<[2], [2], [1], [1], [0, 0, 0, 1, 1, 1], [0], [0]>} : vector<2x8x16xbf16>, vector<2x8x16xbf16>, vector<2x8x8xf32> -> vector<2x8x8xf32>
    "tpu.trace_stop"() : () -> ()
    %cst_10 = arith.constant dense<0xFF800000> : vector<2x8xf32>
    %32 = vector.multi_reduction <maximumf>, %31, %cst_10 [2] : vector<2x8x8xf32> to vector<2x8xf32>
    %33 = vector.shape_cast %32 : vector<2x8xf32> to vector<2x8x1xf32>
    %34 = vector.broadcast %33 : vector<2x8x1xf32> to vector<2x8x8xf32>
    %35 = arith.subf %31, %34 : vector<2x8x8xf32>
    %36 = math.exp %35 : vector<2x8x8xf32>
    %cst_11 = arith.constant dense<0.000000e+00> : vector<2x8xf32>
    %37 = vector.multi_reduction <add>, %36, %cst_11 [2] : vector<2x8x8xf32> to vector<2x8xf32>
    %38 = vector.shape_cast %37 : vector<2x8xf32> to vector<2x8x1xf32>
    %39 = tpu.reciprocal %38 {approx = true} : vector<2x8x1xf32> -> vector<2x8x1xf32>
    %40 = vector.broadcast %39 : vector<2x8x1xf32> to vector<2x8x8xf32>
    %41 = arith.mulf %36, %40 : vector<2x8x8xf32>
    %42 = arith.truncf %41 : vector<2x8x8xf32> to vector<2x8x8xbf16>
    "tpu.trace_start"() <{level = 10 : i32, message = "bqk,bkd->bqd"}> : () -> ()
    %cst_12 = arith.constant dense<0.000000e+00> : vector<2x8x16xf32>
    %43 = tpu.matmul %42, %30, %cst_12 {dimension_numbers = #tpu.dot_dimension_numbers<[2], [1], [1], [2], [0, 0, 0, 1, 1, 2], [0], [0]>} : vector<2x8x8xbf16>, vector<2x8x16xbf16>, vector<2x8x16xf32> -> vector<2x8x16xf32>
    "tpu.trace_stop"() : () -> ()
    %44 = vector.extract_strided_slice %24 {offsets = [0, 0, 16], sizes = [2, 8, 16], strides = [1, 1, 1]} : vector<2x8x128xf32> to vector<2x8x16xf32>
    %45 = arith.truncf %44 : vector<2x8x16xf32> to vector<2x8x16xbf16>
    %46 = vector.extract_strided_slice %24 {offsets = [0, 0, 48], sizes = [2, 8, 16], strides = [1, 1, 1]} : vector<2x8x128xf32> to vector<2x8x16xf32>
    %47 = arith.truncf %46 : vector<2x8x16xf32> to vector<2x8x16xbf16>
    %48 = vector.extract_strided_slice %24 {offsets = [0, 0, 80], sizes = [2, 8, 16], strides = [1, 1, 1]} : vector<2x8x128xf32> to vector<2x8x16xf32>
    %49 = arith.truncf %48 : vector<2x8x16xf32> to vector<2x8x16xbf16>
    "tpu.trace_start"() <{level = 10 : i32, message = "bqd,bkd->bqk"}> : () -> ()
    %cst_13 = arith.constant dense<0.000000e+00> : vector<2x8x8xf32>
    %50 = tpu.matmul %45, %47, %cst_13 {dimension_numbers = #tpu.dot_dimension_numbers<[2], [2], [1], [1], [0, 0, 0, 1, 1, 1], [0], [0]>} : vector<2x8x16xbf16>, vector<2x8x16xbf16>, vector<2x8x8xf32> -> vector<2x8x8xf32>
    "tpu.trace_stop"() : () -> ()
    %cst_14 = arith.constant dense<0xFF800000> : vector<2x8xf32>
    %51 = vector.multi_reduction <maximumf>, %50, %cst_14 [2] : vector<2x8x8xf32> to vector<2x8xf32>
    %52 = vector.shape_cast %51 : vector<2x8xf32> to vector<2x8x1xf32>
    %53 = vector.broadcast %52 : vector<2x8x1xf32> to vector<2x8x8xf32>
    %54 = arith.subf %50, %53 : vector<2x8x8xf32>
    %55 = math.exp %54 : vector<2x8x8xf32>
    %cst_15 = arith.constant dense<0.000000e+00> : vector<2x8xf32>
    %56 = vector.multi_reduction <add>, %55, %cst_15 [2] : vector<2x8x8xf32> to vector<2x8xf32>
    %57 = vector.shape_cast %56 : vector<2x8xf32> to vector<2x8x1xf32>
    %58 = tpu.reciprocal %57 {approx = true} : vector<2x8x1xf32> -> vector<2x8x1xf32>
    %59 = vector.broadcast %58 : vector<2x8x1xf32> to vector<2x8x8xf32>
    %60 = arith.mulf %55, %59 : vector<2x8x8xf32>
    %61 = arith.truncf %60 : vector<2x8x8xf32> to vector<2x8x8xbf16>
    "tpu.trace_start"() <{level = 10 : i32, message = "bqk,bkd->bqd"}> : () -> ()
    %cst_16 = arith.constant dense<0.000000e+00> : vector<2x8x16xf32>
    %62 = tpu.matmul %61, %49, %cst_16 {dimension_numbers = #tpu.dot_dimension_numbers<[2], [1], [1], [2], [0, 0, 0, 1, 1, 2], [0], [0]>} : vector<2x8x8xbf16>, vector<2x8x16xbf16>, vector<2x8x16xf32> -> vector<2x8x16xf32>
    "tpu.trace_stop"() : () -> ()
    %63 = tpu.concatenate %43, %62 in 2 : vector<2x8x16xf32>, vector<2x8x16xf32> -> vector<2x8x32xf32>
    %64 = vector.shape_cast %63 : vector<2x8x32xf32> to vector<16x32xf32>
    %65 = arith.truncf %64 : vector<16x32xf32> to vector<16x32xbf16>
    %66 = vector.extract_strided_slice %10 {offsets = [0, 384], sizes = [32, 32], strides = [1, 1]} : vector<32x416xbf16> to vector<32x32xbf16>
    %cst_17 = arith.constant dense<0.000000e+00> : vector<16x32xf32>
    %67 = tpu.matmul %65, %66, %cst_17 {dimension_numbers = #tpu.dot_dimension_numbers<[1], [0], [0], [1], [0, 0, 1, 1], [], []>} : vector<16x32xbf16>, vector<32x32xbf16>, vector<16x32xf32> -> vector<16x32xf32>
    %68 = vector.broadcast %12 : vector<1x32xf32> to vector<16x32xf32>
    %69 = arith.addf %67, %68 : vector<16x32xf32>
    %70 = arith.addf %8, %69 : vector<16x32xf32>
    %cst_18 = arith.constant dense<0.000000e+00> : vector<16xf32>
    %71 = vector.multi_reduction <add>, %70, %cst_18 [1] : vector<16x32xf32> to vector<16xf32>
    %72 = vector.shape_cast %71 : vector<16xf32> to vector<16x1xf32>
    %cst_19 = arith.constant 3.200000e+01 : f32
    %73 = vector.broadcast %cst_19 : f32 to vector<16x1xf32>
    %74 = arith.divf %72, %73 : vector<16x1xf32>
    %75 = arith.mulf %70, %70 : vector<16x32xf32>
    %cst_20 = arith.constant dense<0.000000e+00> : vector<16xf32>
    %76 = vector.multi_reduction <add>, %75, %cst_20 [1] : vector<16x32xf32> to vector<16xf32>
    %77 = vector.shape_cast %76 : vector<16xf32> to vector<16x1xf32>
    %cst_21 = arith.constant 3.200000e+01 : f32
    %78 = vector.broadcast %cst_21 : f32 to vector<16x1xf32>
    %79 = arith.divf %77, %78 : vector<16x1xf32>
    %80 = arith.mulf %74, %74 : vector<16x1xf32>
    %81 = arith.subf %79, %80 : vector<16x1xf32>
    %82 = vector.broadcast %74 : vector<16x1xf32> to vector<16x32xf32>
    %83 = arith.subf %70, %82 : vector<16x32xf32>
    %cst_22 = arith.constant 9.99999974E-6 : f32
    %84 = vector.broadcast %cst_22 : f32 to vector<16x1xf32>
    %85 = arith.addf %81, %84 : vector<16x1xf32>
    %86 = math.rsqrt %85 : vector<16x1xf32>
    %87 = vector.broadcast %86 : vector<16x1xf32> to vector<16x32xf32>
    %88 = arith.mulf %83, %87 : vector<16x32xf32>
    %89 = vector.broadcast %15 : vector<1x32xf32> to vector<16x32xf32>
    %90 = arith.mulf %88, %89 : vector<16x32xf32>
    %91 = vector.broadcast %16 : vector<1x32xf32> to vector<16x32xf32>
    %92 = arith.addf %90, %91 : vector<16x32xf32>
    %93 = arith.truncf %92 : vector<16x32xf32> to vector<16x32xbf16>
    %94 = vector.extract_strided_slice %10 {offsets = [0, 128], sizes = [32, 128], strides = [1, 1]} : vector<32x416xbf16> to vector<32x128xbf16>
    %cst_23 = arith.constant dense<0.000000e+00> : vector<16x128xf32>
    %95 = tpu.matmul %93, %94, %cst_23 {dimension_numbers = #tpu.dot_dimension_numbers<[1], [0], [0], [1], [0, 0, 1, 1], [], []>} : vector<16x32xbf16>, vector<32x128xbf16>, vector<16x128xf32> -> vector<16x128xf32>
    %96 = vector.broadcast %13 : vector<1x128xf32> to vector<16x128xf32>
    %97 = arith.addf %95, %96 : vector<16x128xf32>
    %cst_24 = arith.constant 0.000000e+00 : f32
    %98 = vector.broadcast %cst_24 : f32 to vector<16x128xf32>
    %99 = arith.maximumf %97, %98 : vector<16x128xf32>
    %100 = arith.truncf %99 : vector<16x128xf32> to vector<16x128xbf16>
    %101 = vector.extract_strided_slice %10 {offsets = [0, 256], sizes = [32, 128], strides = [1, 1]} : vector<32x416xbf16> to vector<32x128xbf16>
    %cst_25 = arith.constant dense<0.000000e+00> : vector<16x32xf32>
    %102 = tpu.matmul %100, %101, %cst_25 {dimension_numbers = #tpu.dot_dimension_numbers<[1], [1], [0], [0], [0, 0, 1, 0], [], []>} : vector<16x128xbf16>, vector<32x128xbf16>, vector<16x32xf32> -> vector<16x32xf32>
    %103 = vector.broadcast %14 : vector<1x32xf32> to vector<16x32xf32>
    %104 = arith.addf %102, %103 : vector<16x32xf32>
    %105 = arith.addf %92, %104 : vector<16x32xf32>
    %cst_26 = arith.constant dense<0.000000e+00> : vector<16xf32>
    %106 = vector.multi_reduction <add>, %105, %cst_26 [1] : vector<16x32xf32> to vector<16xf32>
    %107 = vector.shape_cast %106 : vector<16xf32> to vector<16x1xf32>
    %cst_27 = arith.constant 3.200000e+01 : f32
    %108 = vector.broadcast %cst_27 : f32 to vector<16x1xf32>
    %109 = arith.divf %107, %108 : vector<16x1xf32>
    %110 = arith.mulf %105, %105 : vector<16x32xf32>
    %cst_28 = arith.constant dense<0.000000e+00> : vector<16xf32>
    %111 = vector.multi_reduction <add>, %110, %cst_28 [1] : vector<16x32xf32> to vector<16xf32>
    %112 = vector.shape_cast %111 : vector<16xf32> to vector<16x1xf32>
    %cst_29 = arith.constant 3.200000e+01 : f32
    %113 = vector.broadcast %cst_29 : f32 to vector<16x1xf32>
    %114 = arith.divf %112, %113 : vector<16x1xf32>
    %115 = arith.mulf %109, %109 : vector<16x1xf32>
    %116 = arith.subf %114, %115 : vector<16x1xf32>
    %117 = vector.broadcast %109 : vector<16x1xf32> to vector<16x32xf32>
    %118 = arith.subf %105, %117 : vector<16x32xf32>
    %cst_30 = arith.constant 9.99999974E-6 : f32
    %119 = vector.broadcast %cst_30 : f32 to vector<16x1xf32>
    %120 = arith.addf %116, %119 : vector<16x1xf32>
    %121 = math.rsqrt %120 : vector<16x1xf32>
    %122 = vector.broadcast %121 : vector<16x1xf32> to vector<16x32xf32>
    %123 = arith.mulf %118, %122 : vector<16x32xf32>
    %124 = vector.broadcast %17 : vector<1x32xf32> to vector<16x32xf32>
    %125 = arith.mulf %123, %124 : vector<16x32xf32>
    %126 = vector.broadcast %18 : vector<1x32xf32> to vector<16x32xf32>
    %127 = arith.addf %125, %126 : vector<16x32xf32>
    %c1 = arith.constant 1 : index
    %c0_31 = arith.constant 0 : index
    %c0_32 = arith.constant 0 : index
    %128 = vector.load %arg1[%c1, %c0_31, %c0_32] : memref<3x32x416xbf16, #tpu.memory_space<vmem>>, vector<1x32x416xbf16>
    %129 = vector.shape_cast %128 : vector<1x32x416xbf16> to vector<32x416xbf16>
    %130 = vector.extract_strided_slice %2 {offsets = [9, 0], sizes = [1, 128], strides = [1, 1]} : vector<32x128xf32> to vector<1x128xf32>
    %131 = vector.extract_strided_slice %2 {offsets = [10, 0], sizes = [1, 32], strides = [1, 1]} : vector<32x128xf32> to vector<1x32xf32>
    %132 = vector.extract_strided_slice %2 {offsets = [11, 0], sizes = [1, 128], strides = [1, 1]} : vector<32x128xf32> to vector<1x128xf32>
    %133 = vector.extract_strided_slice %2 {offsets = [12, 0], sizes = [1, 32], strides = [1, 1]} : vector<32x128xf32> to vector<1x32xf32>
    %134 = vector.extract_strided_slice %2 {offsets = [13, 0], sizes = [1, 32], strides = [1, 1]} : vector<32x128xf32> to vector<1x32xf32>
    %135 = vector.extract_strided_slice %2 {offsets = [14, 0], sizes = [1, 32], strides = [1, 1]} : vector<32x128xf32> to vector<1x32xf32>
    %136 = vector.extract_strided_slice %2 {offsets = [15, 0], sizes = [1, 32], strides = [1, 1]} : vector<32x128xf32> to vector<1x32xf32>
    %137 = vector.extract_strided_slice %2 {offsets = [16, 0], sizes = [1, 32], strides = [1, 1]} : vector<32x128xf32> to vector<1x32xf32>
    %138 = arith.truncf %127 : vector<16x32xf32> to vector<16x32xbf16>
    %139 = vector.extract_strided_slice %129 {offsets = [0, 0], sizes = [32, 128], strides = [1, 1]} : vector<32x416xbf16> to vector<32x128xbf16>
    %cst_33 = arith.constant dense<0.000000e+00> : vector<16x128xf32>
    %140 = tpu.matmul %138, %139, %cst_33 {dimension_numbers = #tpu.dot_dimension_numbers<[1], [0], [0], [1], [0, 0, 1, 1], [], []>} : vector<16x32xbf16>, vector<32x128xbf16>, vector<16x128xf32> -> vector<16x128xf32>
    %141 = vector.broadcast %130 : vector<1x128xf32> to vector<16x128xf32>
    %142 = arith.addf %140, %141 : vector<16x128xf32>
    %143 = vector.shape_cast %142 : vector<16x128xf32> to vector<2x8x128xf32>
    %144 = vector.extract_strided_slice %143 {offsets = [0, 0, 0], sizes = [2, 8, 16], strides = [1, 1, 1]} : vector<2x8x128xf32> to vector<2x8x16xf32>
    %145 = arith.truncf %144 : vector<2x8x16xf32> to vector<2x8x16xbf16>
    %146 = vector.extract_strided_slice %143 {offsets = [0, 0, 32], sizes = [2, 8, 16], strides = [1, 1, 1]} : vector<2x8x128xf32> to vector<2x8x16xf32>
    %147 = arith.truncf %146 : vector<2x8x16xf32> to vector<2x8x16xbf16>
    %148 = vector.extract_strided_slice %143 {offsets = [0, 0, 64], sizes = [2, 8, 16], strides = [1, 1, 1]} : vector<2x8x128xf32> to vector<2x8x16xf32>
    %149 = arith.truncf %148 : vector<2x8x16xf32> to vector<2x8x16xbf16>
    "tpu.trace_start"() <{level = 10 : i32, message = "bqd,bkd->bqk"}> : () -> ()
    %cst_34 = arith.constant dense<0.000000e+00> : vector<2x8x8xf32>
    %150 = tpu.matmul %145, %147, %cst_34 {dimension_numbers = #tpu.dot_dimension_numbers<[2], [2], [1], [1], [0, 0, 0, 1, 1, 1], [0], [0]>} : vector<2x8x16xbf16>, vector<2x8x16xbf16>, vector<2x8x8xf32> -> vector<2x8x8xf32>
    "tpu.trace_stop"() : () -> ()
    %cst_35 = arith.constant dense<0xFF800000> : vector<2x8xf32>
    %151 = vector.multi_reduction <maximumf>, %150, %cst_35 [2] : vector<2x8x8xf32> to vector<2x8xf32>
    %152 = vector.shape_cast %151 : vector<2x8xf32> to vector<2x8x1xf32>
    %153 = vector.broadcast %152 : vector<2x8x1xf32> to vector<2x8x8xf32>
    %154 = arith.subf %150, %153 : vector<2x8x8xf32>
    %155 = math.exp %154 : vector<2x8x8xf32>
    %cst_36 = arith.constant dense<0.000000e+00> : vector<2x8xf32>
    %156 = vector.multi_reduction <add>, %155, %cst_36 [2] : vector<2x8x8xf32> to vector<2x8xf32>
    %157 = vector.shape_cast %156 : vector<2x8xf32> to vector<2x8x1xf32>
    %158 = tpu.reciprocal %157 {approx = true} : vector<2x8x1xf32> -> vector<2x8x1xf32>
    %159 = vector.broadcast %158 : vector<2x8x1xf32> to vector<2x8x8xf32>
    %160 = arith.mulf %155, %159 : vector<2x8x8xf32>
    %161 = arith.truncf %160 : vector<2x8x8xf32> to vector<2x8x8xbf16>
    "tpu.trace_start"() <{level = 10 : i32, message = "bqk,bkd->bqd"}> : () -> ()
    %cst_37 = arith.constant dense<0.000000e+00> : vector<2x8x16xf32>
    %162 = tpu.matmul %161, %149, %cst_37 {dimension_numbers = #tpu.dot_dimension_numbers<[2], [1], [1], [2], [0, 0, 0, 1, 1, 2], [0], [0]>} : vector<2x8x8xbf16>, vector<2x8x16xbf16>, vector<2x8x16xf32> -> vector<2x8x16xf32>
    "tpu.trace_stop"() : () -> ()
    %163 = vector.extract_strided_slice %143 {offsets = [0, 0, 16], sizes = [2, 8, 16], strides = [1, 1, 1]} : vector<2x8x128xf32> to vector<2x8x16xf32>
    %164 = arith.truncf %163 : vector<2x8x16xf32> to vector<2x8x16xbf16>
    %165 = vector.extract_strided_slice %143 {offsets = [0, 0, 48], sizes = [2, 8, 16], strides = [1, 1, 1]} : vector<2x8x128xf32> to vector<2x8x16xf32>
    %166 = arith.truncf %165 : vector<2x8x16xf32> to vector<2x8x16xbf16>
    %167 = vector.extract_strided_slice %143 {offsets = [0, 0, 80], sizes = [2, 8, 16], strides = [1, 1, 1]} : vector<2x8x128xf32> to vector<2x8x16xf32>
    %168 = arith.truncf %167 : vector<2x8x16xf32> to vector<2x8x16xbf16>
    "tpu.trace_start"() <{level = 10 : i32, message = "bqd,bkd->bqk"}> : () -> ()
    %cst_38 = arith.constant dense<0.000000e+00> : vector<2x8x8xf32>
    %169 = tpu.matmul %164, %166, %cst_38 {dimension_numbers = #tpu.dot_dimension_numbers<[2], [2], [1], [1], [0, 0, 0, 1, 1, 1], [0], [0]>} : vector<2x8x16xbf16>, vector<2x8x16xbf16>, vector<2x8x8xf32> -> vector<2x8x8xf32>
    "tpu.trace_stop"() : () -> ()
    %cst_39 = arith.constant dense<0xFF800000> : vector<2x8xf32>
    %170 = vector.multi_reduction <maximumf>, %169, %cst_39 [2] : vector<2x8x8xf32> to vector<2x8xf32>
    %171 = vector.shape_cast %170 : vector<2x8xf32> to vector<2x8x1xf32>
    %172 = vector.broadcast %171 : vector<2x8x1xf32> to vector<2x8x8xf32>
    %173 = arith.subf %169, %172 : vector<2x8x8xf32>
    %174 = math.exp %173 : vector<2x8x8xf32>
    %cst_40 = arith.constant dense<0.000000e+00> : vector<2x8xf32>
    %175 = vector.multi_reduction <add>, %174, %cst_40 [2] : vector<2x8x8xf32> to vector<2x8xf32>
    %176 = vector.shape_cast %175 : vector<2x8xf32> to vector<2x8x1xf32>
    %177 = tpu.reciprocal %176 {approx = true} : vector<2x8x1xf32> -> vector<2x8x1xf32>
    %178 = vector.broadcast %177 : vector<2x8x1xf32> to vector<2x8x8xf32>
    %179 = arith.mulf %174, %178 : vector<2x8x8xf32>
    %180 = arith.truncf %179 : vector<2x8x8xf32> to vector<2x8x8xbf16>
    "tpu.trace_start"() <{level = 10 : i32, message = "bqk,bkd->bqd"}> : () -> ()
    %cst_41 = arith.constant dense<0.000000e+00> : vector<2x8x16xf32>
    %181 = tpu.matmul %180, %168, %cst_41 {dimension_numbers = #tpu.dot_dimension_numbers<[2], [1], [1], [2], [0, 0, 0, 1, 1, 2], [0], [0]>} : vector<2x8x8xbf16>, vector<2x8x16xbf16>, vector<2x8x16xf32> -> vector<2x8x16xf32>
    "tpu.trace_stop"() : () -> ()
    %182 = tpu.concatenate %162, %181 in 2 : vector<2x8x16xf32>, vector<2x8x16xf32> -> vector<2x8x32xf32>
    %183 = vector.shape_cast %182 : vector<2x8x32xf32> to vector<16x32xf32>
    %184 = arith.truncf %183 : vector<16x32xf32> to vector<16x32xbf16>
    %185 = vector.extract_strided_slice %129 {offsets = [0, 384], sizes = [32, 32], strides = [1, 1]} : vector<32x416xbf16> to vector<32x32xbf16>
    %cst_42 = arith.constant dense<0.000000e+00> : vector<16x32xf32>
    %186 = tpu.matmul %184, %185, %cst_42 {dimension_numbers = #tpu.dot_dimension_numbers<[1], [0], [0], [1], [0, 0, 1, 1], [], []>} : vector<16x32xbf16>, vector<32x32xbf16>, vector<16x32xf32> -> vector<16x32xf32>
    %187 = vector.broadcast %131 : vector<1x32xf32> to vector<16x32xf32>
    %188 = arith.addf %186, %187 : vector<16x32xf32>
    %189 = arith.addf %127, %188 : vector<16x32xf32>
    %cst_43 = arith.constant dense<0.000000e+00> : vector<16xf32>
    %190 = vector.multi_reduction <add>, %189, %cst_43 [1] : vector<16x32xf32> to vector<16xf32>
    %191 = vector.shape_cast %190 : vector<16xf32> to vector<16x1xf32>
    %cst_44 = arith.constant 3.200000e+01 : f32
    %192 = vector.broadcast %cst_44 : f32 to vector<16x1xf32>
    %193 = arith.divf %191, %192 : vector<16x1xf32>
    %194 = arith.mulf %189, %189 : vector<16x32xf32>
    %cst_45 = arith.constant dense<0.000000e+00> : vector<16xf32>
    %195 = vector.multi_reduction <add>, %194, %cst_45 [1] : vector<16x32xf32> to vector<16xf32>
    %196 = vector.shape_cast %195 : vector<16xf32> to vector<16x1xf32>
    %cst_46 = arith.constant 3.200000e+01 : f32
    %197 = vector.broadcast %cst_46 : f32 to vector<16x1xf32>
    %198 = arith.divf %196, %197 : vector<16x1xf32>
    %199 = arith.mulf %193, %193 : vector<16x1xf32>
    %200 = arith.subf %198, %199 : vector<16x1xf32>
    %201 = vector.broadcast %193 : vector<16x1xf32> to vector<16x32xf32>
    %202 = arith.subf %189, %201 : vector<16x32xf32>
    %cst_47 = arith.constant 9.99999974E-6 : f32
    %203 = vector.broadcast %cst_47 : f32 to vector<16x1xf32>
    %204 = arith.addf %200, %203 : vector<16x1xf32>
    %205 = math.rsqrt %204 : vector<16x1xf32>
    %206 = vector.broadcast %205 : vector<16x1xf32> to vector<16x32xf32>
    %207 = arith.mulf %202, %206 : vector<16x32xf32>
    %208 = vector.broadcast %134 : vector<1x32xf32> to vector<16x32xf32>
    %209 = arith.mulf %207, %208 : vector<16x32xf32>
    %210 = vector.broadcast %135 : vector<1x32xf32> to vector<16x32xf32>
    %211 = arith.addf %209, %210 : vector<16x32xf32>
    %212 = arith.truncf %211 : vector<16x32xf32> to vector<16x32xbf16>
    %213 = vector.extract_strided_slice %129 {offsets = [0, 128], sizes = [32, 128], strides = [1, 1]} : vector<32x416xbf16> to vector<32x128xbf16>
    %cst_48 = arith.constant dense<0.000000e+00> : vector<16x128xf32>
    %214 = tpu.matmul %212, %213, %cst_48 {dimension_numbers = #tpu.dot_dimension_numbers<[1], [0], [0], [1], [0, 0, 1, 1], [], []>} : vector<16x32xbf16>, vector<32x128xbf16>, vector<16x128xf32> -> vector<16x128xf32>
    %215 = vector.broadcast %132 : vector<1x128xf32> to vector<16x128xf32>
    %216 = arith.addf %214, %215 : vector<16x128xf32>
    %cst_49 = arith.constant 0.000000e+00 : f32
    %217 = vector.broadcast %cst_49 : f32 to vector<16x128xf32>
    %218 = arith.maximumf %216, %217 : vector<16x128xf32>
    %219 = arith.truncf %218 : vector<16x128xf32> to vector<16x128xbf16>
    %220 = vector.extract_strided_slice %129 {offsets = [0, 256], sizes = [32, 128], strides = [1, 1]} : vector<32x416xbf16> to vector<32x128xbf16>
    %cst_50 = arith.constant dense<0.000000e+00> : vector<16x32xf32>
    %221 = tpu.matmul %219, %220, %cst_50 {dimension_numbers = #tpu.dot_dimension_numbers<[1], [1], [0], [0], [0, 0, 1, 0], [], []>} : vector<16x128xbf16>, vector<32x128xbf16>, vector<16x32xf32> -> vector<16x32xf32>
    %222 = vector.broadcast %133 : vector<1x32xf32> to vector<16x32xf32>
    %223 = arith.addf %221, %222 : vector<16x32xf32>
    %224 = arith.addf %211, %223 : vector<16x32xf32>
    %cst_51 = arith.constant dense<0.000000e+00> : vector<16xf32>
    %225 = vector.multi_reduction <add>, %224, %cst_51 [1] : vector<16x32xf32> to vector<16xf32>
    %226 = vector.shape_cast %225 : vector<16xf32> to vector<16x1xf32>
    %cst_52 = arith.constant 3.200000e+01 : f32
    %227 = vector.broadcast %cst_52 : f32 to vector<16x1xf32>
    %228 = arith.divf %226, %227 : vector<16x1xf32>
    %229 = arith.mulf %224, %224 : vector<16x32xf32>
    %cst_53 = arith.constant dense<0.000000e+00> : vector<16xf32>
    %230 = vector.multi_reduction <add>, %229, %cst_53 [1] : vector<16x32xf32> to vector<16xf32>
    %231 = vector.shape_cast %230 : vector<16xf32> to vector<16x1xf32>
    %cst_54 = arith.constant 3.200000e+01 : f32
    %232 = vector.broadcast %cst_54 : f32 to vector<16x1xf32>
    %233 = arith.divf %231, %232 : vector<16x1xf32>
    %234 = arith.mulf %228, %228 : vector<16x1xf32>
    %235 = arith.subf %233, %234 : vector<16x1xf32>
    %236 = vector.broadcast %228 : vector<16x1xf32> to vector<16x32xf32>
    %237 = arith.subf %224, %236 : vector<16x32xf32>
    %cst_55 = arith.constant 9.99999974E-6 : f32
    %238 = vector.broadcast %cst_55 : f32 to vector<16x1xf32>
    %239 = arith.addf %235, %238 : vector<16x1xf32>
    %240 = math.rsqrt %239 : vector<16x1xf32>
    %241 = vector.broadcast %240 : vector<16x1xf32> to vector<16x32xf32>
    %242 = arith.mulf %237, %241 : vector<16x32xf32>
    %243 = vector.broadcast %136 : vector<1x32xf32> to vector<16x32xf32>
    %244 = arith.mulf %242, %243 : vector<16x32xf32>
    %245 = vector.broadcast %137 : vector<1x32xf32> to vector<16x32xf32>
    %246 = arith.addf %244, %245 : vector<16x32xf32>
    %c2 = arith.constant 2 : index
    %c0_56 = arith.constant 0 : index
    %c0_57 = arith.constant 0 : index
    %247 = vector.load %arg1[%c2, %c0_56, %c0_57] : memref<3x32x416xbf16, #tpu.memory_space<vmem>>, vector<1x32x416xbf16>
    %248 = vector.shape_cast %247 : vector<1x32x416xbf16> to vector<32x416xbf16>
    %249 = vector.extract_strided_slice %2 {offsets = [17, 0], sizes = [1, 128], strides = [1, 1]} : vector<32x128xf32> to vector<1x128xf32>
    %250 = vector.extract_strided_slice %2 {offsets = [18, 0], sizes = [1, 32], strides = [1, 1]} : vector<32x128xf32> to vector<1x32xf32>
    %251 = vector.extract_strided_slice %2 {offsets = [19, 0], sizes = [1, 128], strides = [1, 1]} : vector<32x128xf32> to vector<1x128xf32>
    %252 = vector.extract_strided_slice %2 {offsets = [20, 0], sizes = [1, 32], strides = [1, 1]} : vector<32x128xf32> to vector<1x32xf32>
    %253 = vector.extract_strided_slice %2 {offsets = [21, 0], sizes = [1, 32], strides = [1, 1]} : vector<32x128xf32> to vector<1x32xf32>
    %254 = vector.extract_strided_slice %2 {offsets = [22, 0], sizes = [1, 32], strides = [1, 1]} : vector<32x128xf32> to vector<1x32xf32>
    %255 = vector.extract_strided_slice %2 {offsets = [23, 0], sizes = [1, 32], strides = [1, 1]} : vector<32x128xf32> to vector<1x32xf32>
    %256 = vector.extract_strided_slice %2 {offsets = [24, 0], sizes = [1, 32], strides = [1, 1]} : vector<32x128xf32> to vector<1x32xf32>
    %257 = arith.truncf %246 : vector<16x32xf32> to vector<16x32xbf16>
    %258 = vector.extract_strided_slice %248 {offsets = [0, 0], sizes = [32, 128], strides = [1, 1]} : vector<32x416xbf16> to vector<32x128xbf16>
    %cst_58 = arith.constant dense<0.000000e+00> : vector<16x128xf32>
    %259 = tpu.matmul %257, %258, %cst_58 {dimension_numbers = #tpu.dot_dimension_numbers<[1], [0], [0], [1], [0, 0, 1, 1], [], []>} : vector<16x32xbf16>, vector<32x128xbf16>, vector<16x128xf32> -> vector<16x128xf32>
    %260 = vector.broadcast %249 : vector<1x128xf32> to vector<16x128xf32>
    %261 = arith.addf %259, %260 : vector<16x128xf32>
    %262 = vector.shape_cast %261 : vector<16x128xf32> to vector<2x8x128xf32>
    %263 = vector.extract_strided_slice %262 {offsets = [0, 0, 0], sizes = [2, 8, 16], strides = [1, 1, 1]} : vector<2x8x128xf32> to vector<2x8x16xf32>
    %264 = arith.truncf %263 : vector<2x8x16xf32> to vector<2x8x16xbf16>
    %265 = vector.extract_strided_slice %262 {offsets = [0, 0, 32], sizes = [2, 8, 16], strides = [1, 1, 1]} : vector<2x8x128xf32> to vector<2x8x16xf32>
    %266 = arith.truncf %265 : vector<2x8x16xf32> to vector<2x8x16xbf16>
    %267 = vector.extract_strided_slice %262 {offsets = [0, 0, 64], sizes = [2, 8, 16], strides = [1, 1, 1]} : vector<2x8x128xf32> to vector<2x8x16xf32>
    %268 = arith.truncf %267 : vector<2x8x16xf32> to vector<2x8x16xbf16>
    "tpu.trace_start"() <{level = 10 : i32, message = "bqd,bkd->bqk"}> : () -> ()
    %cst_59 = arith.constant dense<0.000000e+00> : vector<2x8x8xf32>
    %269 = tpu.matmul %264, %266, %cst_59 {dimension_numbers = #tpu.dot_dimension_numbers<[2], [2], [1], [1], [0, 0, 0, 1, 1, 1], [0], [0]>} : vector<2x8x16xbf16>, vector<2x8x16xbf16>, vector<2x8x8xf32> -> vector<2x8x8xf32>
    "tpu.trace_stop"() : () -> ()
    %cst_60 = arith.constant dense<0xFF800000> : vector<2x8xf32>
    %270 = vector.multi_reduction <maximumf>, %269, %cst_60 [2] : vector<2x8x8xf32> to vector<2x8xf32>
    %271 = vector.shape_cast %270 : vector<2x8xf32> to vector<2x8x1xf32>
    %272 = vector.broadcast %271 : vector<2x8x1xf32> to vector<2x8x8xf32>
    %273 = arith.subf %269, %272 : vector<2x8x8xf32>
    %274 = math.exp %273 : vector<2x8x8xf32>
    %cst_61 = arith.constant dense<0.000000e+00> : vector<2x8xf32>
    %275 = vector.multi_reduction <add>, %274, %cst_61 [2] : vector<2x8x8xf32> to vector<2x8xf32>
    %276 = vector.shape_cast %275 : vector<2x8xf32> to vector<2x8x1xf32>
    %277 = tpu.reciprocal %276 {approx = true} : vector<2x8x1xf32> -> vector<2x8x1xf32>
    %278 = vector.broadcast %277 : vector<2x8x1xf32> to vector<2x8x8xf32>
    %279 = arith.mulf %274, %278 : vector<2x8x8xf32>
    %280 = arith.truncf %279 : vector<2x8x8xf32> to vector<2x8x8xbf16>
    "tpu.trace_start"() <{level = 10 : i32, message = "bqk,bkd->bqd"}> : () -> ()
    %cst_62 = arith.constant dense<0.000000e+00> : vector<2x8x16xf32>
    %281 = tpu.matmul %280, %268, %cst_62 {dimension_numbers = #tpu.dot_dimension_numbers<[2], [1], [1], [2], [0, 0, 0, 1, 1, 2], [0], [0]>} : vector<2x8x8xbf16>, vector<2x8x16xbf16>, vector<2x8x16xf32> -> vector<2x8x16xf32>
    "tpu.trace_stop"() : () -> ()
    %282 = vector.extract_strided_slice %262 {offsets = [0, 0, 16], sizes = [2, 8, 16], strides = [1, 1, 1]} : vector<2x8x128xf32> to vector<2x8x16xf32>
    %283 = arith.truncf %282 : vector<2x8x16xf32> to vector<2x8x16xbf16>
    %284 = vector.extract_strided_slice %262 {offsets = [0, 0, 48], sizes = [2, 8, 16], strides = [1, 1, 1]} : vector<2x8x128xf32> to vector<2x8x16xf32>
    %285 = arith.truncf %284 : vector<2x8x16xf32> to vector<2x8x16xbf16>
    %286 = vector.extract_strided_slice %262 {offsets = [0, 0, 80], sizes = [2, 8, 16], strides = [1, 1, 1]} : vector<2x8x128xf32> to vector<2x8x16xf32>
    %287 = arith.truncf %286 : vector<2x8x16xf32> to vector<2x8x16xbf16>
    "tpu.trace_start"() <{level = 10 : i32, message = "bqd,bkd->bqk"}> : () -> ()
    %cst_63 = arith.constant dense<0.000000e+00> : vector<2x8x8xf32>
    %288 = tpu.matmul %283, %285, %cst_63 {dimension_numbers = #tpu.dot_dimension_numbers<[2], [2], [1], [1], [0, 0, 0, 1, 1, 1], [0], [0]>} : vector<2x8x16xbf16>, vector<2x8x16xbf16>, vector<2x8x8xf32> -> vector<2x8x8xf32>
    "tpu.trace_stop"() : () -> ()
    %cst_64 = arith.constant dense<0xFF800000> : vector<2x8xf32>
    %289 = vector.multi_reduction <maximumf>, %288, %cst_64 [2] : vector<2x8x8xf32> to vector<2x8xf32>
    %290 = vector.shape_cast %289 : vector<2x8xf32> to vector<2x8x1xf32>
    %291 = vector.broadcast %290 : vector<2x8x1xf32> to vector<2x8x8xf32>
    %292 = arith.subf %288, %291 : vector<2x8x8xf32>
    %293 = math.exp %292 : vector<2x8x8xf32>
    %cst_65 = arith.constant dense<0.000000e+00> : vector<2x8xf32>
    %294 = vector.multi_reduction <add>, %293, %cst_65 [2] : vector<2x8x8xf32> to vector<2x8xf32>
    %295 = vector.shape_cast %294 : vector<2x8xf32> to vector<2x8x1xf32>
    %296 = tpu.reciprocal %295 {approx = true} : vector<2x8x1xf32> -> vector<2x8x1xf32>
    %297 = vector.broadcast %296 : vector<2x8x1xf32> to vector<2x8x8xf32>
    %298 = arith.mulf %293, %297 : vector<2x8x8xf32>
    %299 = arith.truncf %298 : vector<2x8x8xf32> to vector<2x8x8xbf16>
    "tpu.trace_start"() <{level = 10 : i32, message = "bqk,bkd->bqd"}> : () -> ()
    %cst_66 = arith.constant dense<0.000000e+00> : vector<2x8x16xf32>
    %300 = tpu.matmul %299, %287, %cst_66 {dimension_numbers = #tpu.dot_dimension_numbers<[2], [1], [1], [2], [0, 0, 0, 1, 1, 2], [0], [0]>} : vector<2x8x8xbf16>, vector<2x8x16xbf16>, vector<2x8x16xf32> -> vector<2x8x16xf32>
    "tpu.trace_stop"() : () -> ()
    %301 = tpu.concatenate %281, %300 in 2 : vector<2x8x16xf32>, vector<2x8x16xf32> -> vector<2x8x32xf32>
    %302 = vector.shape_cast %301 : vector<2x8x32xf32> to vector<16x32xf32>
    %303 = arith.truncf %302 : vector<16x32xf32> to vector<16x32xbf16>
    %304 = vector.extract_strided_slice %248 {offsets = [0, 384], sizes = [32, 32], strides = [1, 1]} : vector<32x416xbf16> to vector<32x32xbf16>
    %cst_67 = arith.constant dense<0.000000e+00> : vector<16x32xf32>
    %305 = tpu.matmul %303, %304, %cst_67 {dimension_numbers = #tpu.dot_dimension_numbers<[1], [0], [0], [1], [0, 0, 1, 1], [], []>} : vector<16x32xbf16>, vector<32x32xbf16>, vector<16x32xf32> -> vector<16x32xf32>
    %306 = vector.broadcast %250 : vector<1x32xf32> to vector<16x32xf32>
    %307 = arith.addf %305, %306 : vector<16x32xf32>
    %308 = arith.addf %246, %307 : vector<16x32xf32>
    %cst_68 = arith.constant dense<0.000000e+00> : vector<16xf32>
    %309 = vector.multi_reduction <add>, %308, %cst_68 [1] : vector<16x32xf32> to vector<16xf32>
    %310 = vector.shape_cast %309 : vector<16xf32> to vector<16x1xf32>
    %cst_69 = arith.constant 3.200000e+01 : f32
    %311 = vector.broadcast %cst_69 : f32 to vector<16x1xf32>
    %312 = arith.divf %310, %311 : vector<16x1xf32>
    %313 = arith.mulf %308, %308 : vector<16x32xf32>
    %cst_70 = arith.constant dense<0.000000e+00> : vector<16xf32>
    %314 = vector.multi_reduction <add>, %313, %cst_70 [1] : vector<16x32xf32> to vector<16xf32>
    %315 = vector.shape_cast %314 : vector<16xf32> to vector<16x1xf32>
    %cst_71 = arith.constant 3.200000e+01 : f32
    %316 = vector.broadcast %cst_71 : f32 to vector<16x1xf32>
    %317 = arith.divf %315, %316 : vector<16x1xf32>
    %318 = arith.mulf %312, %312 : vector<16x1xf32>
    %319 = arith.subf %317, %318 : vector<16x1xf32>
    %320 = vector.broadcast %312 : vector<16x1xf32> to vector<16x32xf32>
    %321 = arith.subf %308, %320 : vector<16x32xf32>
    %cst_72 = arith.constant 9.99999974E-6 : f32
    %322 = vector.broadcast %cst_72 : f32 to vector<16x1xf32>
    %323 = arith.addf %319, %322 : vector<16x1xf32>
    %324 = math.rsqrt %323 : vector<16x1xf32>
    %325 = vector.broadcast %324 : vector<16x1xf32> to vector<16x32xf32>
    %326 = arith.mulf %321, %325 : vector<16x32xf32>
    %327 = vector.broadcast %253 : vector<1x32xf32> to vector<16x32xf32>
    %328 = arith.mulf %326, %327 : vector<16x32xf32>
    %329 = vector.broadcast %254 : vector<1x32xf32> to vector<16x32xf32>
    %330 = arith.addf %328, %329 : vector<16x32xf32>
    %331 = arith.truncf %330 : vector<16x32xf32> to vector<16x32xbf16>
    %332 = vector.extract_strided_slice %248 {offsets = [0, 128], sizes = [32, 128], strides = [1, 1]} : vector<32x416xbf16> to vector<32x128xbf16>
    %cst_73 = arith.constant dense<0.000000e+00> : vector<16x128xf32>
    %333 = tpu.matmul %331, %332, %cst_73 {dimension_numbers = #tpu.dot_dimension_numbers<[1], [0], [0], [1], [0, 0, 1, 1], [], []>} : vector<16x32xbf16>, vector<32x128xbf16>, vector<16x128xf32> -> vector<16x128xf32>
    %334 = vector.broadcast %251 : vector<1x128xf32> to vector<16x128xf32>
    %335 = arith.addf %333, %334 : vector<16x128xf32>
    %cst_74 = arith.constant 0.000000e+00 : f32
    %336 = vector.broadcast %cst_74 : f32 to vector<16x128xf32>
    %337 = arith.maximumf %335, %336 : vector<16x128xf32>
    %338 = arith.truncf %337 : vector<16x128xf32> to vector<16x128xbf16>
    %339 = vector.extract_strided_slice %248 {offsets = [0, 256], sizes = [32, 128], strides = [1, 1]} : vector<32x416xbf16> to vector<32x128xbf16>
    %cst_75 = arith.constant dense<0.000000e+00> : vector<16x32xf32>
    %340 = tpu.matmul %338, %339, %cst_75 {dimension_numbers = #tpu.dot_dimension_numbers<[1], [1], [0], [0], [0, 0, 1, 0], [], []>} : vector<16x128xbf16>, vector<32x128xbf16>, vector<16x32xf32> -> vector<16x32xf32>
    %341 = vector.broadcast %252 : vector<1x32xf32> to vector<16x32xf32>
    %342 = arith.addf %340, %341 : vector<16x32xf32>
    %343 = arith.addf %330, %342 : vector<16x32xf32>
    %cst_76 = arith.constant dense<0.000000e+00> : vector<16xf32>
    %344 = vector.multi_reduction <add>, %343, %cst_76 [1] : vector<16x32xf32> to vector<16xf32>
    %345 = vector.shape_cast %344 : vector<16xf32> to vector<16x1xf32>
    %cst_77 = arith.constant 3.200000e+01 : f32
    %346 = vector.broadcast %cst_77 : f32 to vector<16x1xf32>
    %347 = arith.divf %345, %346 : vector<16x1xf32>
    %348 = arith.mulf %343, %343 : vector<16x32xf32>
    %cst_78 = arith.constant dense<0.000000e+00> : vector<16xf32>
    %349 = vector.multi_reduction <add>, %348, %cst_78 [1] : vector<16x32xf32> to vector<16xf32>
    %350 = vector.shape_cast %349 : vector<16xf32> to vector<16x1xf32>
    %cst_79 = arith.constant 3.200000e+01 : f32
    %351 = vector.broadcast %cst_79 : f32 to vector<16x1xf32>
    %352 = arith.divf %350, %351 : vector<16x1xf32>
    %353 = arith.mulf %347, %347 : vector<16x1xf32>
    %354 = arith.subf %352, %353 : vector<16x1xf32>
    %355 = vector.broadcast %347 : vector<16x1xf32> to vector<16x32xf32>
    %356 = arith.subf %343, %355 : vector<16x32xf32>
    %cst_80 = arith.constant 9.99999974E-6 : f32
    %357 = vector.broadcast %cst_80 : f32 to vector<16x1xf32>
    %358 = arith.addf %354, %357 : vector<16x1xf32>
    %359 = math.rsqrt %358 : vector<16x1xf32>
    %360 = vector.broadcast %359 : vector<16x1xf32> to vector<16x32xf32>
    %361 = arith.mulf %356, %360 : vector<16x32xf32>
    %362 = vector.broadcast %255 : vector<1x32xf32> to vector<16x32xf32>
    %363 = arith.mulf %361, %362 : vector<16x32xf32>
    %364 = vector.broadcast %256 : vector<1x32xf32> to vector<16x32xf32>
    %365 = arith.addf %363, %364 : vector<16x32xf32>
    %366 = vector.extract_strided_slice %365 {offsets = [0, 0], sizes = [8, 32], strides = [1, 1]} : vector<16x32xf32> to vector<8x32xf32>
    %cst_81 = arith.constant dense<0.000000e+00> : vector<32xf32>
    %367 = vector.multi_reduction <add>, %366, %cst_81 [0] : vector<8x32xf32> to vector<32xf32>
    %368 = vector.shape_cast %367 : vector<32xf32> to vector<1x32xf32>
    %369 = vector.extract_strided_slice %365 {offsets = [8, 0], sizes = [8, 32], strides = [1, 1]} : vector<16x32xf32> to vector<8x32xf32>
    %cst_82 = arith.constant dense<0.000000e+00> : vector<32xf32>
    %370 = vector.multi_reduction <add>, %369, %cst_82 [0] : vector<8x32xf32> to vector<32xf32>
    %371 = vector.shape_cast %370 : vector<32xf32> to vector<1x32xf32>
    %372 = tpu.concatenate %368, %371 in 0 : vector<1x32xf32>, vector<1x32xf32> -> vector<2x32xf32>
    %cst_83 = arith.constant 1.250000e-01 : f32
    %373 = vector.broadcast %cst_83 : f32 to vector<2x32xf32>
    %374 = arith.mulf %372, %373 : vector<2x32xf32>
    %375 = arith.truncf %374 : vector<2x32xf32> to vector<2x32xbf16>
    %376 = vector.extract_strided_slice %1 {offsets = [0, 160], sizes = [32, 32], strides = [1, 1]} : vector<32x192xbf16> to vector<32x32xbf16>
    %cst_84 = arith.constant dense<0.000000e+00> : vector<2x32xf32>
    %377 = tpu.matmul %375, %376, %cst_84 {dimension_numbers = #tpu.dot_dimension_numbers<[1], [0], [0], [1], [0, 0, 1, 1], [], []>} : vector<2x32xbf16>, vector<32x32xbf16>, vector<2x32xf32> -> vector<2x32xf32>
    %378 = vector.extract_strided_slice %2 {offsets = [25, 0], sizes = [1, 32], strides = [1, 1]} : vector<32x128xf32> to vector<1x32xf32>
    %379 = vector.broadcast %378 : vector<1x32xf32> to vector<2x32xf32>
    %380 = arith.addf %377, %379 : vector<2x32xf32>
    %cst_85 = arith.constant 0.707106769 : f32
    %381 = vector.broadcast %cst_85 : f32 to vector<2x32xf32>
    %382 = arith.mulf %380, %381 : vector<2x32xf32>
    %383 = math.absf %382 : vector<2x32xf32>
    %cst_86 = arith.constant 0.327591091 : f32
    %384 = vector.broadcast %cst_86 : f32 to vector<2x32xf32>
    %385 = arith.mulf %384, %383 : vector<2x32xf32>
    %cst_87 = arith.constant 1.000000e+00 : f32
    %386 = vector.broadcast %cst_87 : f32 to vector<2x32xf32>
    %387 = arith.addf %386, %385 : vector<2x32xf32>
    %cst_88 = arith.constant 1.000000e+00 : f32
    %388 = vector.broadcast %cst_88 : f32 to vector<2x32xf32>
    %389 = arith.divf %388, %387 : vector<2x32xf32>
    %cst_89 = arith.constant 1.06140542 : f32
    %390 = vector.broadcast %cst_89 : f32 to vector<2x32xf32>
    %391 = arith.mulf %389, %390 : vector<2x32xf32>
    %cst_90 = arith.constant -1.45315206 : f32
    %392 = vector.broadcast %cst_90 : f32 to vector<2x32xf32>
    %393 = arith.addf %392, %391 : vector<2x32xf32>
    %394 = arith.mulf %389, %393 : vector<2x32xf32>
    %cst_91 = arith.constant 1.42141378 : f32
    %395 = vector.broadcast %cst_91 : f32 to vector<2x32xf32>
    %396 = arith.addf %395, %394 : vector<2x32xf32>
    %397 = arith.mulf %389, %396 : vector<2x32xf32>
    %cst_92 = arith.constant -0.284496725 : f32
    %398 = vector.broadcast %cst_92 : f32 to vector<2x32xf32>
    %399 = arith.addf %398, %397 : vector<2x32xf32>
    %400 = arith.mulf %389, %399 : vector<2x32xf32>
    %cst_93 = arith.constant 0.254829586 : f32
    %401 = vector.broadcast %cst_93 : f32 to vector<2x32xf32>
    %402 = arith.addf %401, %400 : vector<2x32xf32>
    %403 = arith.mulf %389, %402 : vector<2x32xf32>
    %cst_94 = arith.constant 0.000000e+00 : f32
    %404 = vector.broadcast %cst_94 : f32 to vector<2x32xf32>
    %405 = arith.subf %404, %383 : vector<2x32xf32>
    %406 = arith.mulf %405, %383 : vector<2x32xf32>
    %407 = math.exp %406 : vector<2x32xf32>
    %408 = arith.mulf %403, %407 : vector<2x32xf32>
    %cst_95 = arith.constant 1.000000e+00 : f32
    %409 = vector.broadcast %cst_95 : f32 to vector<2x32xf32>
    %410 = arith.subf %409, %408 : vector<2x32xf32>
    %cst_96 = arith.constant 0.000000e+00 : f32
    %411 = vector.broadcast %cst_96 : f32 to vector<2x32xf32>
    %412 = arith.cmpf oge, %382, %411 : vector<2x32xf32>
    %cst_97 = arith.constant 0.000000e+00 : f32
    %413 = vector.broadcast %cst_97 : f32 to vector<2x32xf32>
    %414 = arith.subf %413, %410 : vector<2x32xf32>
    %415 = arith.select %412, %410, %414 : vector<2x32xi1>, vector<2x32xf32>
    %cst_98 = arith.constant 5.000000e-01 : f32
    %416 = vector.broadcast %cst_98 : f32 to vector<2x32xf32>
    %417 = arith.mulf %416, %380 : vector<2x32xf32>
    %cst_99 = arith.constant 1.000000e+00 : f32
    %418 = vector.broadcast %cst_99 : f32 to vector<2x32xf32>
    %419 = arith.addf %418, %415 : vector<2x32xf32>
    %420 = arith.mulf %417, %419 : vector<2x32xf32>
    %421 = arith.truncf %420 : vector<2x32xf32> to vector<2x32xbf16>
    %422 = vector.extract_strided_slice %1 {offsets = [0, 0], sizes = [32, 128], strides = [1, 1]} : vector<32x192xbf16> to vector<32x128xbf16>
    %cst_100 = arith.constant dense<0.000000e+00> : vector<2x128xf32>
    %423 = tpu.matmul %421, %422, %cst_100 {dimension_numbers = #tpu.dot_dimension_numbers<[1], [0], [0], [1], [0, 0, 1, 1], [], []>} : vector<2x32xbf16>, vector<32x128xbf16>, vector<2x128xf32> -> vector<2x128xf32>
    %424 = vector.extract_strided_slice %2 {offsets = [26, 0], sizes = [1, 128], strides = [1, 1]} : vector<32x128xf32> to vector<1x128xf32>
    %425 = vector.broadcast %424 : vector<1x128xf32> to vector<2x128xf32>
    %426 = arith.addf %423, %425 : vector<2x128xf32>
    %cst_101 = arith.constant 0.000000e+00 : f32
    %427 = vector.broadcast %cst_101 : f32 to vector<6x128xf32>
    %428 = tpu.concatenate %426, %427 in 0 : vector<2x128xf32>, vector<6x128xf32> -> vector<8x128xf32>
    %c0_102 = arith.constant 0 : index
    %c0_103 = arith.constant 0 : index
    %429 = vector.load %arg4[%c0_102, %c0_103] : memref<8x128xf32, #tpu.memory_space<vmem>>, vector<8x128xf32>
    tpu.vector_store %arg4[%c0_102, %c0_103], %428 {strides = array<i32>} : memref<8x128xf32, #tpu.memory_space<vmem>>, vector<8x128xf32>,
    return
  }
}

</mosaic_0001>

<bundles_post_ra>
// kernel: tpu_custom_call.1
= control target key start
LH: loop header
LB: loop body
LE: loop exit
PB: predicated region body
PF: predicated region fallthrough
CT: control target
= control target key end

     0   :  { %9 = vsyncpa [#allocation3], 0  ;;  %s3932_s0 = inlined_call_operand.hbm [shape: f32[16,16], index: 0, kind: input, shape index: {}]   ;;  %s3933_s1 = inlined_call_operand.hbm [shape: bf16[3,32,416], index: 1, kind: input, shape index: {}]   ;;  %s3934_s2 = inlined_call_operand.hbm [shape: bf16[32,192], index: 2, kind: input, shape index: {}]   ;;  %s3935_s3 = inlined_call_operand.hbm [shape: f32[32,128], index: 3, kind: input, shape index: {}]   ;;  %s3936_s4 = inlined_call_operand.hbm [shape: f32[8,128], index: 4, kind: output, shape index: {}]  }
   0x1   :  { %10 = vsyncpa [#allocation6], 0 }
   0x2   :  { %11 = vsyncpa [#allocation9], 0 }
   0x3   :  { %12 = vsyncpa [#allocation4], 0  ;;  %s3354_s15 = smov [#allocation5]   ;;  %s3236_s19 = scalar_lea.hbm %s3933_s1, 3072 }
   0x4   :  { %s30_s16 = sshll.u32 %s3354_s15, 4  ;;  %p3237_p0 = scmp.ne.s32.totalorder %s3933_s1, %s3236_s19  ;;  %s31_s16 = int_to_ptr.vmem [resolvable:$true] %s30_s16 }
   0x5   :  { %p3240_p1 = scmp.lt.u32.totalorder %s3236_s19, %s3933_s1 }
   0x7   :  { %p3242_p2 = pnand %p3240_p1, %p3237_p0 }
   0x9   :  { %3245 = shalt.err (!%p3242_p2)
}
   0xa   :  { %s3246_s24 = scalar_lea.vmem %s31_s16, 3072  ;;  %p3251_p4 = scmp.lt.s32.totalorder %s31_s16, %s31_s16 }
   0xb   :  { %p3247_p3 = scmp.ne.s32.totalorder %s31_s16, %s3246_s24  ;;  %p3252_p5 = scmp.lt.s32.totalorder %s3246_s24, %s3246_s24 }
   0xd   :  { %p3253_p6 = por %p3252_p5, %p3251_p4 }
   0xf   :  { %p3254_p7 = pnand %p3253_p6, %p3247_p3 }
  0x11   :  { %3257 = shalt.err (!%p3254_p7)
}
  0x12   :  { %s3355_s25 = smov 256   ;;  %s3356_s26 = smov 16  }
  0x13   :  { %36 = dma.hbm_to_vmem [thread:$0]  %s3933_s1, 3072, %s31_s16, [#allocation6], %s3355_s25, %s3355_s25, %s3356_s26  }
  0x14   :  { %s3357_s29 = smov [#allocation2]   ;;  %s3258_s7 = scalar_lea.hbm %s3932_s0, 256 }
  0x15   :  { %s18_s30 = sshll.u32 %s3357_s29, 4  ;;  %p3259_p8 = scmp.ne.s32.totalorder %s3932_s0, %s3258_s7  ;;  %s19_s30 = int_to_ptr.vmem [resolvable:$true] %s18_s30 }
  0x16   :  { %p3262_p9 = scmp.lt.u32.totalorder %s3258_s7, %s3932_s0 }
  0x18   :  { %p3264_p10 = pnand %p3262_p9, %p3259_p8 }
  0x1a   :  { %3267 = shalt.err (!%p3264_p10)
}
  0x1b   :  { %s3268_s12 = scalar_lea.vmem %s19_s30, 256  ;;  %p3273_p12 = scmp.lt.s32.totalorder %s19_s30, %s19_s30 }
  0x1c   :  { %p3269_p11 = scmp.ne.s32.totalorder %s19_s30, %s3268_s12  ;;  %p3274_p13 = scmp.lt.s32.totalorder %s3268_s12, %s3268_s12 }
  0x1e   :  { %p3275_p0 = por %p3274_p13, %p3273_p12 }
  0x20   :  { %p3276_p1 = pnand %p3275_p0, %p3269_p11 }
  0x22   :  { %3279 = shalt.err (!%p3276_p1)
}
  0x23   :  { %s3358_s1 = smov 128   ;;  %s3359_s13 = smov 8  }
  0x24   :  { %24 = dma.hbm_to_vmem [thread:$0]  %s3932_s0, 256, %s19_s30, [#allocation3], %s3358_s1, %s3358_s1, %s3359_s13  }
  0x25   :  { %s3360_s16 = smov [#allocation7]   ;;  %s3361_s18 = smov [#allocation8]  }
  0x26   :  { %s42_s17 = sshll.u32 %s3360_s16, 4  ;;  %s54_s19 = sshll.u32 %s3361_s18, 4  ;;  %s43_s17 = int_to_ptr.vmem [resolvable:$true] %s42_s17  ;;  %s3423_s19 = int_to_ptr.vmem [resolvable:$true] %s54_s19 }
  0x27   :  { %s3280_s22 = scalar_lea.hbm %s3934_s2, 512 }
  0x28   :  { %p3281_p2 = scmp.ne.s32.totalorder %s3934_s2, %s3280_s22  ;;  %p3284_p3 = scmp.lt.u32.totalorder %s3280_s22, %s3934_s2 }
  0x2a   :  { %p3286_p4 = pnand %p3284_p3, %p3281_p2 }
  0x2c   :  { %3289 = shalt.err (!%p3286_p4)
}
  0x2d   :  { %s3290_s0 = scalar_lea.vmem %s43_s17, 512  ;;  %p3295_p6 = scmp.lt.s32.totalorder %s43_s17, %s43_s17 }
  0x2e   :  { %p3291_p5 = scmp.ne.s32.totalorder %s43_s17, %s3290_s0  ;;  %p3296_p7 = scmp.lt.s32.totalorder %s3290_s0, %s3290_s0 }
  0x30   :  { %p3297_p8 = por %p3296_p7, %p3295_p6 }
  0x32   :  { %p3298_p9 = pnand %p3297_p8, %p3291_p5 }
  0x34   :  { %3301 = shalt.err (!%p3298_p9)
}
  0x35   :  { %48 = dma.hbm_to_vmem [thread:$0]  %s3934_s2, 512, %s43_s17, [#allocation6], %s3358_s1, %s3358_s1, %s3359_s13  }
  0x36   :  { %s3302_s6 = scalar_lea.hbm %s3935_s3, 512 }
  0x37   :  { %p3303_p10 = scmp.ne.s32.totalorder %s3935_s3, %s3302_s6  ;;  %p3306_p11 = scmp.lt.u32.totalorder %s3302_s6, %s3935_s3 }
  0x39   :  { %p3308_p12 = pnand %p3306_p11, %p3303_p10 }
  0x3b   :  { %3311 = shalt.err (!%p3308_p12)
}
  0x3c   :  { %s3312_s11 = scalar_lea.vmem %s3423_s19, 512  ;;  %p3317_p0 = scmp.lt.s32.totalorder %s3423_s19, %s3423_s19 }
  0x3d   :  { %p3313_p13 = scmp.ne.s32.totalorder %s3423_s19, %s3312_s11  ;;  %p3318_p1 = scmp.lt.s32.totalorder %s3312_s11, %s3312_s11 }
  0x3f   :  { %p3319_p2 = por %p3318_p1, %p3317_p0 }
  0x41   :  { %p3320_p3 = pnand %p3319_p2, %p3313_p13 }
  0x43   :  { %3323 = shalt.err (!%p3320_p3)
}
  0x44   :  { %60 = dma.hbm_to_vmem [thread:$0]  %s3935_s3, 512, %s3423_s19, [#allocation9], %s3358_s1, %s3358_s1, %s3359_s13  }
  0x45   :  { %3346 = dma.done.wait [#allocation3], 256  }
  0x46   :  { %3347 = vsyncadd [#allocation3], 4294967040 }
  0x47   :  { %3348 = dma.done.wait [#allocation6], 3584  }
  0x48   :  { %3349 = vsyncadd [#allocation6], 4294963712 }
  0x49   :  { %3350 = dma.done.wait [#allocation9], 512  }
  0x4a   :  { %3351 = vsyncadd [#allocation9], 4294966784  ;;  %v3362_v0 = vmov 0.0   ;;  %vm3363_vm0 = vmmov 0   ;;  %v3117_v1 = vld [vmem:[#allocation7 + $0x4] ss:$8 sps:$4 sm:$0xff]   ;;  %v85_v7 = vlaneseq }
  0x4b   :  { %2824 = vmatprep.subr.bf16.mxu0 %v3362_v0  ;;  %2826 = vmatprep.mubr.msk.bf16.mxu0 %vm3363_vm0, %v3362_v0  ;;  %v74_v2 = vld [vmem:[#allocation2] sm:$0xff]  ;;  %v75_v3 = vld [vmem:[#allocation2 + $0x8] sm:$0xff]  ;;  %vm95_vm1 = vcmask 130048   ;;  %v3477_v10 = vld [vmem:[#allocation8] sm:$0xff]  ;;  %vm165_vm2 = vcmask 261120   ;;  %s3364_s3 = smov 96  }
  0x4c   :  { %2830 = vmatprep.subr.bf16.mxu1 %v3362_v0  ;;  %2834 = vmatprep.mubr.msk.bf16.mxu1 %vm3363_vm0, %v3362_v0  ;;  %v84_v4 = vpack.c.bf16 %v75_v3, %v74_v2  ;;  %v3120_v5 = vld [vmem:[#allocation5] ss:$16 sps:$4 sm:$0xff]   ;;  %v3472_v8 = vshrl.u32 %v85_v7, 7  ;;  %vm310_vm3 = vcmask 64512   ;;  %s3365_s1 = smov 64   ;;  %s3366_s13 = smov 80  }
  0x4d   :  { %2825 = vmatpush3.bf16.msra.mxu0 %v3117_v1  ;;  %2831 = vmatpush3.bf16.msra.mxu1 %v3120_v5  ;;  %v3123_v6 = vld [vmem:[#allocation5 + $0x20] ss:$16 sps:$4 sm:$0xff]   ;;  %vm340_vm4 = vcmask 1043456   ;;  %s3367_s14 = smov 112   ;;  %s3368_s15 = smov 48   ;;  %vm2503_vm5 = vcmask 1040384  }
  0x4e   :  { %2838 = vmatprep.subr.bf16.mxu0 %v3362_v0  ;;  %2832 = vmatprep.subr.bf16.mxu1 %v3362_v0  ;;  %v3475_v9 = vsub.s32 0, %v3472_v8  ;;  %v3491_v19 = vsub.s32 1, %v3472_v8  ;;  %vm2648_vm7 = vcmask 1041408  }
  0x50   :  { %2827 = vmatmul.mubr.msk.bf16.vlgmr.msra.gmra.mrb[0].mxu0 %vm95_vm1, %v84_v4  ;;  %v88_v11 = vrot.slane %v3477_v10, %v3475_v9  ;;  %v152_v20 = vrot.slane %v3477_v10, %v3491_v19 }
  0x51   :  { %2840 = vmatprep.mubr.msk.bf16.mxu0 %vm3363_vm0, %v3362_v0  ;;  %2833 = vmatpush3.bf16.msra.mxu1 %v3123_v6 }
  0x52   :  { %2844 = vmatprep.subr.bf16.mxu1 %v3362_v0 }
 0x123   :  { %v133_v12 = vpop.f32.mrb[0].mxu0 }
 0x124   :  { %v2828_v13 = vpop.f32.mrb[1].mxu0  ;;  %v3481_v15 = vadd.f32 %v133_v12, %v88_v11 }
 0x125   :  { %v136_v14 = vpop.f32.mrb[2].mxu0 }
 0x126   :  { %v3483_v16 = vadd.f32 %v136_v14, %v88_v11  ;;  %v2829_v17 = vpop.f32.mrb[3].mxu0 }
 0x128   :  { %v148_v18 = vpack.c.bf16 %v3483_v16, %v3481_v15 }
 0x12a   :  { %2835 = vmatmul.mubr.msk.bf16.vlgmr.msra.gmra.mrb[0].mxu1 %vm165_vm2, %v148_v18 }
 0x12b   :  { %2846 = vmatprep.mubr.msk.bf16.mxu1 %vm3363_vm0, %v3362_v0 }
 0x1fd   :  { %v203_v21 = vpop.f32.mrb[0].mxu1 }
 0x1fe   :  { %v204_v22 = vadd.f32 %v203_v21, %v152_v20  ;;  %v2836_v23 = vpop.f32.mrb[1].mxu1 }
 0x1ff   :  { %v206_v24 = vpop.f32.mrb[2].mxu1 }
 0x200   :  { %v3495_v25 = vpack.c.bf16 %v204_v22, %v204_v22  ;;  %v207_v26 = vadd.f32 %v206_v24, %v152_v20  ;;  %v2837_v27 = vpop.f32.mrb[3].mxu1 }
 0x202   :  { %213 = vrot.lane.b32.xlu0 %v3495_v25, %s3364_s3  ;;  %v3499_v28 = vpack.c.bf16 %v207_v26, %v207_v26 }
 0x206   :  { %262 = vrot.lane.b32.xlu0 %v3499_v28, %s3364_s3 }
 0x274   :  { %v214_v29 = vpop.permute.xlu0 %213 }
 0x275   :  { %v219_v30 = vsel %vm95_vm1, %v214_v29, 0 }
 0x276   :  { %2839 = vmatpush3.bf16.xpose.msra.mxu0 %v219_v30 }
 0x277   :  { %2850 = vmatprep.subr.bf16.mxu0 %v3362_v0 }
 0x278   :  { %v263_v31 = vpop.permute.xlu0 %262 }
 0x279   :  { %v268_v32 = vsel %vm95_vm1, %v263_v31, 0 }
 0x27a   :  { %2845 = vmatpush3.bf16.xpose.msra.mxu1 %v268_v32 }
 0x27b   :  { %2856 = vmatprep.subr.bf16.mxu1 %v3362_v0 }
 0x27d   :  { %2841 = vmatmul.mubr.msk.bf16.vlgmr.msra.gmra.mrb[4].mxu0 %vm95_vm1, %v3495_v25 }
 0x27e   :  { %2852 = vmatprep.mubr.msk.bf16.mxu0 %vm3363_vm0, %v3362_v0 }
 0x281   :  { %2847 = vmatmul.mubr.msk.bf16.vlgmr.msra.gmra.mrb[4].mxu1 %vm95_vm1, %v3499_v28 }
 0x282   :  { %2858 = vmatprep.mubr.msk.bf16.mxu1 %vm3363_vm0, %v3362_v0 }
 0x350   :  { %v255_v33 = vpop.f32.mrb[4].mxu0 }
 0x351   :  { %v2842_v34 = vpop.f32.mrb[5].mxu0  ;;  %v311_v35 = vsel %vm310_vm3, %v255_v33, -inf }
 0x352   :  { %312 = vmax.xlane.f32.xlu1 %v311_v35  ;;  %v258_v36 = vpop.f32.mrb[6].mxu0 }
 0x353   :  { %v2843_v37 = vpop.f32.mrb[7].mxu0 }
 0x354   :  { %v304_v38 = vpop.f32.mrb[4].mxu1 }
 0x355   :  { %v2848_v39 = vpop.f32.mrb[5].mxu1  ;;  %v314_v40 = vsel %vm310_vm3, %v304_v38, -inf }
 0x356   :  { %v307_v41 = vpop.f32.mrb[6].mxu1  ;;  %315 = vmax.xlane.f32.xlu1 %v314_v40 }
 0x357   :  { %v2849_v42 = vpop.f32.mrb[7].mxu1 }
 0x367   :  { %335 = vrot.lane.b32.xlu1 %v3495_v25, %s3365_s1 }
 0x36b   :  { %384 = vrot.lane.b32.xlu1 %v3499_v28, %s3365_s1 }
 0x36f   :  { %434 = vrot.lane.b32.xlu1 %v3495_v25, %s3366_s13 }
 0x3df   :  { %v313_v43 = vpop.xlane.xlu1 %312 }
 0x3e0   :  { %v317_v44 = vsub.f32 %v255_v33, %v313_v43 }
 0x3e2   :  { %v319_v45 = vmul.f32 1.442695, %v317_v44 }
 0x3e3   :  { %v316_v46 = vpop.xlane.xlu1 %315 }
 0x3e4   :  { %3159 = vpow2.f32 %v319_v45  ;;  %v318_v47 = vsub.f32 %v304_v38, %v316_v46 }
 0x3e6   :  { %v321_v48 = vmul.f32 1.442695, %v318_v47 }
 0x3e7   :  { %v336_v49 = vpop.permute.xlu1 %335 }
 0x3e8   :  { %3161 = vpow2.f32 %v321_v48  ;;  %v342_v50 = vsel %vm340_vm4, %v336_v49, 0 }
 0x3e9   :  { %2851 = vmatpush3.bf16.msra.mxu0 %v342_v50 }
 0x3ea   :  { %2862 = vmatprep.subr.bf16.mxu0 %v3362_v0 }
 0x3eb   :  { %v385_v51 = vpop.permute.xlu1 %384 }
 0x3ec   :  { %v390_v52 = vsel %vm340_vm4, %v385_v51, 0 }
 0x3ed   :  { %2857 = vmatpush3.bf16.msra.mxu1 %v390_v52 }
 0x3ee   :  { %v3160_v53 = vpop.eup %3159  ;;  %2868 = vmatprep.subr.bf16.mxu1 %v3362_v0 }
 0x3ef   :  { %v323_v54 = vsel %vm310_vm3, %v3160_v53, 0.0  ;;  %v435_v57 = vpop.permute.xlu1 %434 }
 0x3f0   :  { %324 = vadd.xlane.f32.xlu0 %v323_v54  ;;  %v440_v1 = vsel %vm95_vm1, %v435_v57, 0  ;;  %v3122_v54 = vld [vmem:[#allocation5 + $0x4] ss:$16 sps:$4 sm:$0xff]   ;;  %v3128_v57 = vld [vmem:[#allocation5 + $0x2c] ss:$16 sps:$4 sm:$0xff]  }
 0x3f2   :  { %v3162_v55 = vpop.eup %3161 }
 0x3f3   :  { %v326_v56 = vsel %vm310_vm3, %v3162_v55, 0.0 }
 0x3f4   :  { %327 = vadd.xlane.f32.xlu1 %v326_v56  ;;  %v3126_v56 = vld [vmem:[#allocation5 + $0xc] ss:$16 sps:$4 sm:$0xff]  }
 0x405   :  { %484 = vrot.lane.b32.xlu1 %v3499_v28, %s3366_s13 }
 0x406   :  { %432 = vrot.lane.b32.xlu0 %v3495_v25, %s3367_s14 }
 0x409   :  { %482 = vrot.lane.b32.xlu1 %v3499_v28, %s3367_s14 }
 0x47d   :  { %v325_v58 = vpop.xlane.xlu0 %324 }
 0x47e   :  { %3163 = vrcp.f32 %v325_v58 }
 0x481   :  { %v328_v59 = vpop.xlane.xlu1 %327  ;;  %v433_v6 = vpop.permute.xlu0 %432 }
 0x482   :  { %3165 = vrcp.f32 %v328_v59 }
 0x485   :  { %v485_v3 = vpop.permute.xlu1 %484 }
 0x486   :  { %v490_v5 = vsel %vm95_vm1, %v485_v3, 0 }
 0x488   :  { %v3164_v60 = vpop.eup %3163 }
 0x489   :  { %v331_v61 = vmul.f32 %v3164_v60, %v3160_v53  ;;  %v483_v7 = vpop.permute.xlu1 %482 }
 0x48b   :  { %v333_v62 = vpack.c.bf16 %v331_v61, %v331_v61 }
 0x48c   :  { %v3166_v63 = vpop.eup %3165 }
 0x48d   :  { %v332_v2 = vmul.f32 %v3166_v63, %v3162_v55  ;;  %2853 = vmatmul.mubr.msk.bf16.vlgmr.msra.gmra.mrb[8].mxu0 %vm310_vm3, %v333_v62  ;;  %v3125_v55 = vld [vmem:[#allocation5 + $0x24] ss:$16 sps:$4 sm:$0xff]  }
 0x48e   :  { %2863 = vmatpush3.bf16.xpose.msra.mxu0 %v440_v1  ;;  %2864 = vmatprep.mubr.msk.bf16.mxu0 %vm3363_vm0, %v3362_v0 }
 0x48f   :  { %v334_v4 = vpack.c.bf16 %v332_v2, %v332_v2  ;;  %2874 = vmatprep.subr.bf16.mxu0 %v3362_v0 }
 0x491   :  { %2859 = vmatmul.mubr.msk.bf16.vlgmr.msra.gmra.mrb[8].mxu1 %vm310_vm3, %v334_v4 }
 0x492   :  { %2869 = vmatpush3.bf16.xpose.msra.mxu1 %v490_v5  ;;  %2870 = vmatprep.mubr.msk.bf16.mxu1 %vm3363_vm0, %v3362_v0 }
 0x493   :  { %2880 = vmatprep.subr.bf16.mxu1 %v3362_v0 }
 0x495   :  { %2865 = vmatmul.mubr.msk.bf16.vlgmr.msra.gmra.mrb[12].mxu0 %vm95_vm1, %v433_v6 }
 0x496   :  { %2876 = vmatprep.mubr.msk.bf16.mxu0 %vm3363_vm0, %v3362_v0 }
 0x499   :  { %2871 = vmatmul.mubr.msk.bf16.vlgmr.msra.gmra.mrb[12].mxu1 %vm95_vm1, %v483_v7 }
 0x49a   :  { %2882 = vmatprep.mubr.msk.bf16.mxu1 %vm3363_vm0, %v3362_v0 }
 0x560   :  { %v3551_v11 = vpop.f32.mrb[8].mxu0 }
 0x561   :  { %v2854_v12 = vpop.f32.mrb[9].mxu0 }
 0x562   :  { %v381_v13 = vpop.f32.mrb[10].mxu0 }
 0x563   :  { %v2855_v14 = vpop.f32.mrb[11].mxu0 }
 0x564   :  { %v3553_v17 = vpop.f32.mrb[8].mxu1  ;;  %v3586_v14 = vsub.s32 2, %v3472_v8 }
 0x565   :  { %v2860_v18 = vpop.f32.mrb[9].mxu1 }
 0x566   :  { %v429_v20 = vpop.f32.mrb[10].mxu1  ;;  %v666_v18 = vrot.slane %v3477_v10, %v3586_v14 }
 0x567   :  { %v2861_v21 = vpop.f32.mrb[11].mxu1 }
 0x568   :  { %v476_v22 = vpop.f32.mrb[12].mxu0 }
 0x569   :  { %v2866_v23 = vpop.f32.mrb[13].mxu0  ;;  %v532_v24 = vsel %vm310_vm3, %v476_v22, -inf }
 0x56a   :  { %533 = vmax.xlane.f32.xlu1 %v532_v24  ;;  %v479_v26 = vpop.f32.mrb[14].mxu0 }
 0x56b   :  { %v2867_v27 = vpop.f32.mrb[15].mxu0 }
 0x56c   :  { %v526_v29 = vpop.f32.mrb[12].mxu1 }
 0x56d   :  { %v2872_v30 = vpop.f32.mrb[13].mxu1  ;;  %v535_v31 = vsel %vm310_vm3, %v526_v29, -inf }
 0x56e   :  { %536 = vmax.xlane.f32.xlu0 %v535_v31  ;;  %v529_v32 = vpop.f32.mrb[14].mxu1 }
 0x56f   :  { %v2873_v33 = vpop.f32.mrb[15].mxu1 }
 0x584   :  { %604 = vrot.lane.b32.xlu0 %v3499_v28, %s3368_s15 }
 0x5f7   :  { %v534_v34 = vpop.xlane.xlu1 %533 }
 0x5f8   :  { %v538_v35 = vsub.f32 %v476_v22, %v534_v34  ;;  %v3130_v34 = vld [vmem:[#allocation5 + $0x8] ss:$16 sps:$4 sm:$0xff]  }
 0x5fa   :  { %v540_v36 = vmul.f32 1.442695, %v538_v35 }
 0x5fb   :  { %v537_v37 = vpop.xlane.xlu0 %536 }
 0x5fc   :  { %3167 = vpow2.f32 %v540_v36  ;;  %v539_v38 = vsub.f32 %v526_v29, %v537_v37 }
 0x5fe   :  { %v542_v39 = vmul.f32 1.442695, %v539_v38 }
 0x5ff   :  { %v605_v40 = vpop.permute.xlu0 %604 }
 0x600   :  { %3169 = vpow2.f32 %v542_v39  ;;  %v610_v41 = vsel %vm340_vm4, %v605_v40, 0 }
 0x601   :  { %2881 = vmatpush3.bf16.msra.mxu1 %v610_v41 }
 0x602   :  { %2894 = vmatprep.subr.bf16.mxu1 %v3362_v0 }
 0x606   :  { %v3168_v42 = vpop.eup %3167 }
 0x607   :  { %v544_v43 = vsel %vm310_vm3, %v3168_v42, 0.0 }
 0x608   :  { %545 = vadd.xlane.f32.xlu1 %v544_v43 }
 0x60a   :  { %v3170_v44 = vpop.eup %3169 }
 0x60b   :  { %v547_v28 = vsel %vm310_vm3, %v3170_v44, 0.0 }
 0x60c   :  { %548 = vadd.xlane.f32.xlu1 %v547_v28 }
 0x61d   :  { %556 = vrot.lane.b32.xlu1 %v3495_v25, %s3368_s15 }
 0x695   :  { %v546_v45 = vpop.xlane.xlu1 %545 }
 0x696   :  { %3171 = vrcp.f32 %v546_v45 }
 0x699   :  { %v549_v46 = vpop.xlane.xlu1 %548 }
 0x69a   :  { %3173 = vrcp.f32 %v549_v46  ;;  %v3598_v46 = vsub.s32 5, %v3472_v8 }
 0x69d   :  { %v557_v47 = vpop.permute.xlu1 %556 }
 0x69e   :  { %v562_v48 = vsel %vm340_vm4, %v557_v47, 0 }
 0x69f   :  { %2875 = vmatpush3.bf16.msra.mxu0 %v562_v48  ;;  %v759_v48 = vrot.slane %v3477_v10, %v3598_v46 }
 0x6a0   :  { %v3172_v49 = vpop.eup %3171  ;;  %2886 = vmatprep.subr.bf16.mxu0 %v3362_v0 }
 0x6a1   :  { %v552_v50 = vmul.f32 %v3172_v49, %v3168_v42  ;;  %v3603_v49 = vsub.s32 6, %v3472_v8 }
 0x6a3   :  { %v554_v51 = vpack.c.bf16 %v552_v50, %v552_v50 }
 0x6a4   :  { %v3174_v52 = vpop.eup %3173 }
 0x6a5   :  { %v553_v53 = vmul.f32 %v3174_v52, %v3170_v44  ;;  %2877 = vmatmul.mubr.msk.bf16.vlgmr.msra.gmra.mrb[16].mxu0 %vm310_vm3, %v554_v51 }
 0x6a6   :  { %2890 = vmatprep.mubr.msk.bf16.mxu0 %vm3363_vm0, %v3362_v0  ;;  %2887 = vmatpush3.bf16.msra.mxu0 %v3126_v56 }
 0x6a7   :  { %v555_v25 = vpack.c.bf16 %v553_v53, %v553_v53  ;;  %2888 = vmatprep.subr.bf16.mxu0 %v3362_v0 }
 0x6a9   :  { %2883 = vmatmul.mubr.msk.bf16.vlgmr.msra.gmra.mrb[16].mxu1 %vm310_vm3, %v555_v25 }
 0x6aa   :  { %2895 = vmatpush3.bf16.msra.mxu1 %v3122_v54  ;;  %2898 = vmatprep.mubr.msk.bf16.mxu1 %vm3363_vm0, %v3362_v0 }
 0x6ab   :  { %2896 = vmatprep.subr.bf16.mxu1 %v3362_v0  ;;  %2889 = vmatpush3.bf16.msra.mxu0 %v3128_v57 }
 0x6ac   :  { %2902 = vmatprep.subr.bf16.mxu0 %v3362_v0 }
 0x6ae   :  { %2897 = vmatpush3.bf16.msra.mxu1 %v3125_v55  ;;  %v765_v55 = vrot.slane %v3477_v10, %v3603_v49 }
 0x6af   :  { %2910 = vmatprep.subr.bf16.mxu1 %v3362_v0 }
 0x778   :  { %v598_v58 = vpop.f32.mrb[16].mxu0 }
 0x779   :  { %v2878_v59 = vpop.f32.mrb[17].mxu0 }
 0x77a   :  { %v601_v60 = vpop.f32.mrb[18].mxu0 }
 0x77b   :  { %v2879_v61 = vpop.f32.mrb[19].mxu0  ;;  %v3131_v60 = vld [vmem:[#allocation5 + $0x28] ss:$16 sps:$4 sm:$0xff]  }
 0x77c   :  { %v646_v62 = vpop.f32.mrb[16].mxu1  ;;  %v3612_v61 = vsub.s32 3, %v3472_v8 }
 0x77d   :  { %v3102_v63 = vpack.i.bf16 %v646_v62, %v598_v58  ;;  %v2884_v1 = vpop.f32.mrb[17].mxu1 }
 0x77e   :  { %v649_v2 = vpop.f32.mrb[18].mxu1  ;;  %v772_v62 = vrot.slane %v3477_v10, %v3612_v61 }
 0x77f   :  { %v2885_v3 = vpop.f32.mrb[19].mxu1  ;;  %3103 = vrot.lane.b32.xlu1 %v3102_v63, %s3356_s26 }
 0x7f1   :  { %v3104_v4 = vpop.permute.xlu1 %3103 }
 0x7f2   :  { %v3106_v5 = vunpack.i.h.bf16 %v3104_v4  ;;  %v3105_v6 = vunpack.i.l.bf16 %v3104_v4 }
 0x7f4   :  { %v661_v7 = vsel %vm95_vm1, %v3553_v17, %v3106_v5  ;;  %v660_v12 = vsel %vm95_vm1, %v3551_v11, %v3105_v6 }
 0x7f5   :  { %v662_v13 = vpack.c.bf16 %v661_v7, %v660_v12 }
 0x7f7   :  { %2891 = vmatmul.mubr.msk.bf16.vlgmr.msra.gmra.mrb[20].mxu0 %vm165_vm2, %v662_v13  ;;  %v3619_v13 = vsub.s32 4, %v3472_v8 }
 0x7f8   :  { %2906 = vmatprep.mubr.msk.bf16.mxu0 %vm3363_vm0, %v3362_v0  ;;  %2903 = vmatpush3.bf16.xpose.msra.mxu0 %v3130_v34  ;;  %v3132_v34 = vld [vmem:[#allocation5 + $0x40] ss:$16 sps:$4 sm:$0xff]  }
 0x7f9   :  { %2904 = vmatprep.subr.bf16.mxu0 %v3362_v0 }
 0x800   :  { %2905 = vmatpush3.bf16.xpose.msra.mxu0 %v3131_v60 }
 0x801   :  { %2924 = vmatprep.subr.bf16.mxu0 %v3362_v0 }
 0x8ca   :  { %v716_v20 = vpop.f32.mrb[20].mxu0 }
 0x8cb   :  { %v717_v21 = vadd.f32 %v716_v20, %v666_v18  ;;  %v2892_v22 = vpop.f32.mrb[21].mxu0 }
 0x8cc   :  { %v719_v23 = vpop.f32.mrb[22].mxu0 }
 0x8cd   :  { %v723_v17 = vadd.f32 %v717_v21, %v3481_v15  ;;  %v720_v24 = vadd.f32 %v719_v23, %v666_v18  ;;  %v2893_v11 = vpop.f32.mrb[23].mxu0  ;;  %v831_v18 = vrot.slane %v3477_v10, %v3619_v13 }
 0x8cf   :  { %v724_v26 = vadd.f32 %v720_v24, %v3483_v16  ;;  %v725_v27 = vsel %vm165_vm2, %v723_v17, 0.0  ;;  %v734_v31 = vmul.f32 %v723_v17, %v723_v17 }
 0x8d0   :  { %726 = vadd.xlane.f32.xlu1 %v725_v27 }
 0x8d1   :  { %v728_v29 = vsel %vm165_vm2, %v724_v26, 0.0  ;;  %v735_v30 = vmul.f32 %v724_v26, %v724_v26  ;;  %v736_v33 = vsel %vm165_vm2, %v734_v31, 0.0 }
 0x8d2   :  { %729 = vadd.xlane.f32.xlu0 %v728_v29 }
 0x8d3   :  { %v739_v32 = vsel %vm165_vm2, %v735_v30, 0.0 }
 0x8d4   :  { %740 = vadd.xlane.f32.xlu1 %v739_v32 }
 0x8d6   :  { %737 = vadd.xlane.f32.xlu0 %v736_v33 }
 0x95d   :  { %v727_v15 = vpop.xlane.xlu1 %726 }
 0x95e   :  { %v732_v35 = vmul.f32 0.03125, %v727_v15  ;;  %v3134_v15 = vld [vmem:[#allocation5 + $0x60] ss:$16 sps:$4 sm:$0xff]  }
 0x95f   :  { %v730_v16 = vpop.xlane.xlu0 %729 }
 0x960   :  { %v733_v36 = vmul.f32 0.03125, %v730_v16  ;;  %v744_v41 = vmul.f32 %v732_v35, %v732_v35  ;;  %v748_v51 = vsub.f32 %v723_v17, %v732_v35 }
 0x961   :  { %v741_v37 = vpop.xlane.xlu1 %740 }
 0x962   :  { %v745_v38 = vmul.f32 %v733_v36, %v733_v36  ;;  %v743_v39 = vmul.f32 0.03125, %v741_v37  ;;  %v749_v47 = vsub.f32 %v724_v26, %v733_v36 }
 0x963   :  { %v738_v40 = vpop.xlane.xlu0 %737 }
 0x964   :  { %v747_v42 = vsub.f32 %v743_v39, %v745_v38  ;;  %v742_v43 = vmul.f32 0.03125, %v738_v40 }
 0x966   :  { %v751_v44 = vadd.f32 1e-05, %v747_v42  ;;  %v746_v28 = vsub.f32 %v742_v43, %v744_v41 }
 0x968   :  { %3175 = vrsqrt.f32 %v751_v44  ;;  %v750_v45 = vadd.f32 1e-05, %v746_v28 }
 0x96a   :  { %3177 = vrsqrt.f32 %v750_v45 }
 0x972   :  { %v3176_v50 = vpop.eup %3175 }
 0x973   :  { %v755_v52 = vmul.f32 %v3176_v50, %v749_v47 }
 0x974   :  { %v3178_v53 = vpop.eup %3177 }
 0x975   :  { %v754_v54 = vmul.f32 %v3178_v53, %v748_v51  ;;  %v761_v25 = vmul.f32 %v759_v48, %v755_v52  ;;  %v3634_v53 = vld [vmem:[#allocation8 + $0x8] sm:$0xff] }
 0x977   :  { %v760_v56 = vmul.f32 %v759_v48, %v754_v54  ;;  %v767_v58 = vadd.f32 %v765_v55, %v761_v25  ;;  %v3630_v48 = vsub.s32 7, %v3472_v8 }
 0x979   :  { %v766_v57 = vadd.f32 %v765_v55, %v760_v56  ;;  %v916_v51 = vrot.slane %v3477_v10, %v3630_v48  ;;  %v938_v10 = vrot.slane %v3634_v53, %v3491_v19 }
 0x97b   :  { %v768_v59 = vpack.c.bf16 %v767_v58, %v766_v57 }
 0x97d   :  { %2899 = vmatmul.mubr.msk.bf16.vlgmr.msra.gmra.mrb[20].mxu1 %vm165_vm2, %v768_v59 }
 0x97e   :  { %2914 = vmatprep.mubr.msk.bf16.mxu1 %vm3363_vm0, %v3362_v0  ;;  %2911 = vmatpush3.bf16.msra.mxu1 %v3132_v34 }
 0x97f   :  { %2912 = vmatprep.subr.bf16.mxu1 %v3362_v0 }
 0x982   :  { %2913 = vmatpush3.bf16.msra.mxu1 %v3134_v15 }
 0x983   :  { %2918 = vmatprep.subr.bf16.mxu1 %v3362_v0 }
 0xa50   :  { %v818_v63 = vpop.f32.mrb[20].mxu1 }
 0xa51   :  { %v819_v1 = vadd.f32 %v818_v63, %v772_v62  ;;  %v2900_v2 = vpop.f32.mrb[21].mxu1 }
 0xa52   :  { %v821_v3 = vpop.f32.mrb[22].mxu1 }
 0xa53   :  { %v822_v4 = vadd.f32 %v821_v3, %v772_v62  ;;  %v2901_v5 = vpop.f32.mrb[23].mxu1  ;;  %v825_v6 = vmax.f32 %v819_v1, 0.0 }
 0xa55   :  { %v826_v7 = vmax.f32 %v822_v4, 0.0 }
 0xa57   :  { %v827_v12 = vpack.c.bf16 %v826_v7, %v825_v6 }
 0xa59   :  { %2907 = vmatmul.mubr.bf16.vlgmr.msra.gmra.mrb[24].mxu0 %v827_v12 }
 0xa5a   :  { %2926 = vmatprep.mubr.msk.bf16.mxu0 %vm3363_vm0, %v3362_v0 }
 0xb2c   :  { %v874_v20 = vpop.f32.mrb[24].mxu0 }
 0xb2d   :  { %v875_v21 = vadd.f32 %v874_v20, %v831_v18  ;;  %v2908_v22 = vpop.f32.mrb[25].mxu0 }
 0xb2e   :  { %v877_v23 = vpop.f32.mrb[26].mxu0 }
 0xb2f   :  { %v881_v17 = vadd.f32 %v875_v21, %v766_v57  ;;  %v878_v24 = vadd.f32 %v877_v23, %v831_v18  ;;  %v2909_v11 = vpop.f32.mrb[27].mxu0 }
 0xb31   :  { %v882_v26 = vadd.f32 %v878_v24, %v767_v58  ;;  %v883_v27 = vsel %vm165_vm2, %v881_v17, 0.0  ;;  %v891_v29 = vmul.f32 %v881_v17, %v881_v17  ;;  %v922_v58 = vrot.slane %v3634_v53, %v3475_v9 }
 0xb32   :  { %884 = vadd.xlane.f32.xlu0 %v883_v27 }
 0xb33   :  { %v886_v30 = vsel %vm165_vm2, %v882_v26, 0.0  ;;  %v892_v31 = vmul.f32 %v882_v26, %v882_v26  ;;  %v893_v32 = vsel %vm165_vm2, %v891_v29, 0.0 }
 0xb34   :  { %887 = vadd.xlane.f32.xlu1 %v886_v30 }
 0xb35   :  { %v896_v33 = vsel %vm165_vm2, %v892_v31, 0.0 }
 0xb36   :  { %894 = vadd.xlane.f32.xlu0 %v893_v32 }
 0xb38   :  { %897 = vadd.xlane.f32.xlu1 %v896_v33 }
 0xbbf   :  { %v885_v16 = vpop.xlane.xlu0 %884 }
 0xbc0   :  { %v889_v35 = vmul.f32 0.03125, %v885_v16 }
 0xbc1   :  { %v888_v36 = vpop.xlane.xlu1 %887 }
 0xbc2   :  { %v890_v37 = vmul.f32 0.03125, %v888_v36  ;;  %v901_v39 = vmul.f32 %v889_v35, %v889_v35  ;;  %v905_v50 = vsub.f32 %v881_v17, %v889_v35 }
 0xbc3   :  { %v895_v38 = vpop.xlane.xlu0 %894 }
 0xbc4   :  { %v899_v40 = vmul.f32 0.03125, %v895_v38  ;;  %v902_v42 = vmul.f32 %v890_v37, %v890_v37  ;;  %v906_v54 = vsub.f32 %v882_v26, %v890_v37 }
 0xbc5   :  { %v898_v41 = vpop.xlane.xlu1 %897 }
 0xbc6   :  { %v903_v43 = vsub.f32 %v899_v40, %v901_v39  ;;  %v900_v44 = vmul.f32 0.03125, %v898_v41 }
 0xbc8   :  { %v907_v28 = vadd.f32 1e-05, %v903_v43  ;;  %v904_v45 = vsub.f32 %v900_v44, %v902_v42 }
 0xbca   :  { %3179 = vrsqrt.f32 %v907_v28  ;;  %v908_v47 = vadd.f32 1e-05, %v904_v45 }
 0xbcc   :  { %3181 = vrsqrt.f32 %v908_v47 }
 0xbd4   :  { %v3180_v52 = vpop.eup %3179 }
 0xbd5   :  { %v911_v25 = vmul.f32 %v3180_v52, %v905_v50 }
 0xbd6   :  { %v3182_v55 = vpop.eup %3181 }
 0xbd7   :  { %v912_v56 = vmul.f32 %v3182_v55, %v906_v54  ;;  %v917_v57 = vmul.f32 %v916_v51, %v911_v25 }
 0xbd9   :  { %v918_v59 = vmul.f32 %v916_v51, %v912_v56  ;;  %v3638_v60 = vadd.f32 %v922_v58, %v917_v57 }
 0xbdb   :  { %v3640_v8 = vadd.f32 %v922_v58, %v918_v59 }
 0xbdd   :  { %v934_v62 = vpack.c.bf16 %v3640_v8, %v3638_v60 }
 0xbdf   :  { %2915 = vmatmul.mubr.msk.bf16.vlgmr.msra.gmra.mrb[24].mxu1 %vm165_vm2, %v934_v62 }
 0xbe0   :  { %2920 = vmatprep.mubr.msk.bf16.mxu1 %vm3363_vm0, %v3362_v0 }
 0xcb2   :  { %v988_v63 = vpop.f32.mrb[24].mxu1 }
 0xcb3   :  { %v989_v1 = vadd.f32 %v988_v63, %v938_v10  ;;  %v2916_v2 = vpop.f32.mrb[25].mxu1 }
 0xcb4   :  { %v991_v3 = vpop.f32.mrb[26].mxu1 }
 0xcb5   :  { %v3649_v4 = vpack.c.bf16 %v989_v1, %v989_v1  ;;  %v992_v5 = vadd.f32 %v991_v3, %v938_v10  ;;  %v2917_v6 = vpop.f32.mrb[27].mxu1 }
 0xcb7   :  { %v3651_v7 = vpack.c.bf16 %v992_v5, %v992_v5  ;;  %998 = vrot.lane.b32.xlu0 %v3649_v4, %s3364_s3 }
 0xcb9   :  { %1047 = vrot.lane.b32.xlu1 %v3651_v7, %s3364_s3 }
 0xd29   :  { %v999_v12 = vpop.permute.xlu0 %998 }
 0xd2a   :  { %v1004_v18 = vsel %vm95_vm1, %v999_v12, 0 }
 0xd2b   :  { %2919 = vmatpush3.bf16.xpose.msra.mxu1 %v1004_v18  ;;  %v1048_v20 = vpop.permute.xlu1 %1047 }
 0xd2c   :  { %v1053_v21 = vsel %vm95_vm1, %v1048_v20, 0  ;;  %2930 = vmatprep.subr.bf16.mxu1 %v3362_v0 }
 0xd2d   :  { %2925 = vmatpush3.bf16.xpose.msra.mxu0 %v1053_v21 }
 0xd2e   :  { %2936 = vmatprep.subr.bf16.mxu0 %v3362_v0 }
 0xd32   :  { %2921 = vmatmul.mubr.msk.bf16.vlgmr.msra.gmra.mrb[28].mxu1 %vm95_vm1, %v3649_v4 }
 0xd33   :  { %2932 = vmatprep.mubr.msk.bf16.mxu1 %vm3363_vm0, %v3362_v0 }
 0xd34   :  { %2927 = vmatmul.mubr.msk.bf16.vlgmr.msra.gmra.mrb[28].mxu0 %vm95_vm1, %v3651_v7 }
 0xd35   :  { %2938 = vmatprep.mubr.msk.bf16.mxu0 %vm3363_vm0, %v3362_v0 }
 0xe05   :  { %v1040_v22 = vpop.f32.mrb[28].mxu1 }
 0xe06   :  { %v2922_v23 = vpop.f32.mrb[29].mxu1  ;;  %v1095_v17 = vsel %vm310_vm3, %v1040_v22, -inf }
 0xe07   :  { %1096 = vmax.xlane.f32.xlu1 %v1095_v17  ;;  %v1043_v24 = vpop.f32.mrb[30].mxu1  ;;  %v1089_v11 = vpop.f32.mrb[28].mxu0 }
 0xe08   :  { %v2923_v26 = vpop.f32.mrb[31].mxu1  ;;  %v2928_v27 = vpop.f32.mrb[29].mxu0  ;;  %v1098_v29 = vsel %vm310_vm3, %v1089_v11, -inf }
 0xe09   :  { %1099 = vmax.xlane.f32.xlu0 %v1098_v29  ;;  %v1092_v30 = vpop.f32.mrb[30].mxu0 }
 0xe0a   :  { %v2929_v31 = vpop.f32.mrb[31].mxu0 }
 0xe18   :  { %1167 = vrot.lane.b32.xlu1 %v3651_v7, %s3365_s1 }
 0xe1f   :  { %1119 = vrot.lane.b32.xlu0 %v3649_v4, %s3365_s1 }
 0xe94   :  { %v1097_v32 = vpop.xlane.xlu1 %1096 }
 0xe95   :  { %v1101_v33 = vsub.f32 %v1040_v22, %v1097_v32 }
 0xe96   :  { %v1100_v34 = vpop.xlane.xlu0 %1099 }
 0xe97   :  { %v1103_v15 = vmul.f32 1.442695, %v1101_v33  ;;  %v1102_v16 = vsub.f32 %v1089_v11, %v1100_v34 }
 0xe98   :  { %v1168_v35 = vpop.permute.xlu1 %1167 }
 0xe99   :  { %3183 = vpow2.f32 %v1103_v15  ;;  %v1105_v36 = vmul.f32 1.442695, %v1102_v16  ;;  %v1173_v37 = vsel %vm340_vm4, %v1168_v35, 0 }
 0xe9a   :  { %2937 = vmatpush3.bf16.msra.mxu0 %v1173_v37  ;;  %v1120_v38 = vpop.permute.xlu0 %1119 }
 0xe9b   :  { %3185 = vpow2.f32 %v1105_v36  ;;  %v1125_v39 = vsel %vm340_vm4, %v1120_v38, 0  ;;  %2948 = vmatprep.subr.bf16.mxu0 %v3362_v0 }
 0xe9c   :  { %2931 = vmatpush3.bf16.msra.mxu1 %v1125_v39 }
 0xe9d   :  { %2942 = vmatprep.subr.bf16.mxu1 %v3362_v0 }
 0xea3   :  { %v3184_v40 = vpop.eup %3183 }
 0xea4   :  { %v1107_v41 = vsel %vm310_vm3, %v3184_v40, 0.0 }
 0xea5   :  { %v3186_v42 = vpop.eup %3185  ;;  %1108 = vadd.xlane.f32.xlu0 %v1107_v41 }
 0xea6   :  { %v1110_v43 = vsel %vm310_vm3, %v3186_v42, 0.0 }
 0xea7   :  { %1111 = vadd.xlane.f32.xlu1 %v1110_v43 }
 0xeb8   :  { %1217 = vrot.lane.b32.xlu1 %v3649_v4, %s3366_s13 }
 0xebb   :  { %1267 = vrot.lane.b32.xlu0 %v3651_v7, %s3366_s13 }
 0xebc   :  { %1215 = vrot.lane.b32.xlu1 %v3649_v4, %s3367_s14 }
 0xebf   :  { %1265 = vrot.lane.b32.xlu0 %v3651_v7, %s3367_s14 }
 0xf32   :  { %v1109_v44 = vpop.xlane.xlu0 %1108 }
 0xf33   :  { %3187 = vrcp.f32 %v1109_v44 }
 0xf34   :  { %v1112_v28 = vpop.xlane.xlu1 %1111 }
 0xf35   :  { %3189 = vrcp.f32 %v1112_v28 }
 0xf36   :  { %v1268_v25 = vpop.permute.xlu0 %1267 }
 0xf37   :  { %v1273_v57 = vsel %vm95_vm1, %v1268_v25, 0 }
 0xf38   :  { %v1218_v51 = vpop.permute.xlu1 %1217 }
 0xf39   :  { %v1223_v55 = vsel %vm95_vm1, %v1218_v51, 0 }
 0xf3a   :  { %v1266_v59 = vpop.permute.xlu0 %1265 }
 0xf3c   :  { %v1216_v58 = vpop.permute.xlu1 %1215 }
 0xf3d   :  { %v3188_v45 = vpop.eup %3187 }
 0xf3e   :  { %v1115_v47 = vmul.f32 %v3188_v45, %v3184_v40  ;;  %v3136_v45 = vld [vmem:[#allocation5 + $0x4c] ss:$16 sps:$4 sm:$0xff]  }
 0xf3f   :  { %v3190_v50 = vpop.eup %3189 }
 0xf40   :  { %v1116_v52 = vmul.f32 %v3190_v50, %v3186_v42  ;;  %v1117_v54 = vpack.c.bf16 %v1115_v47, %v1115_v47  ;;  %v3138_v47 = vld [vmem:[#allocation5 + $0x6c] ss:$16 sps:$4 sm:$0xff]  }
 0xf42   :  { %2933 = vmatmul.mubr.msk.bf16.vlgmr.msra.gmra.mrb[32].mxu1 %vm310_vm3, %v1117_v54  ;;  %v1118_v56 = vpack.c.bf16 %v1116_v52, %v1116_v52 }
 0xf43   :  { %2943 = vmatpush3.bf16.xpose.msra.mxu1 %v1223_v55  ;;  %2944 = vmatprep.mubr.msk.bf16.mxu1 %vm3363_vm0, %v3362_v0 }
 0xf44   :  { %2939 = vmatmul.mubr.msk.bf16.vlgmr.msra.gmra.mrb[32].mxu0 %vm310_vm3, %v1118_v56  ;;  %2954 = vmatprep.subr.bf16.mxu1 %v3362_v0 }
 0xf45   :  { %2949 = vmatpush3.bf16.xpose.msra.mxu0 %v1273_v57  ;;  %2950 = vmatprep.mubr.msk.bf16.mxu0 %vm3363_vm0, %v3362_v0 }
 0xf46   :  { %2960 = vmatprep.subr.bf16.mxu0 %v3362_v0 }
 0xf4a   :  { %2945 = vmatmul.mubr.msk.bf16.vlgmr.msra.gmra.mrb[36].mxu1 %vm95_vm1, %v1216_v58 }
 0xf4b   :  { %2956 = vmatprep.mubr.msk.bf16.mxu1 %vm3363_vm0, %v3362_v0 }
 0xf4c   :  { %2951 = vmatmul.mubr.msk.bf16.vlgmr.msra.gmra.mrb[36].mxu0 %vm95_vm1, %v1266_v59 }
 0xf4d   :  { %2962 = vmatprep.mubr.msk.bf16.mxu0 %vm3363_vm0, %v3362_v0 }
0x1015   :  { %v3705_v62 = vpop.f32.mrb[32].mxu1 }
0x1016   :  { %v2934_v10 = vpop.f32.mrb[33].mxu1 }
0x1017   :  { %v1164_v63 = vpop.f32.mrb[34].mxu1  ;;  %v3707_v1 = vpop.f32.mrb[32].mxu0 }
0x1018   :  { %v2935_v2 = vpop.f32.mrb[35].mxu1  ;;  %v2940_v3 = vpop.f32.mrb[33].mxu0 }
0x1019   :  { %v1212_v5 = vpop.f32.mrb[34].mxu0 }
0x101a   :  { %v2941_v6 = vpop.f32.mrb[35].mxu0 }
0x101b   :  { %v1449_v6 = vrot.slane %v3634_v53, %v3586_v14 }
0x101d   :  { %v1259_v12 = vpop.f32.mrb[36].mxu1 }
0x101e   :  { %v2946_v18 = vpop.f32.mrb[37].mxu1  ;;  %v1315_v20 = vsel %vm310_vm3, %v1259_v12, -inf }
0x101f   :  { %1316 = vmax.xlane.f32.xlu1 %v1315_v20  ;;  %v1262_v21 = vpop.f32.mrb[38].mxu1  ;;  %v1309_v22 = vpop.f32.mrb[36].mxu0 }
0x1020   :  { %v2947_v23 = vpop.f32.mrb[39].mxu1  ;;  %v2952_v17 = vpop.f32.mrb[37].mxu0  ;;  %v1318_v24 = vsel %vm310_vm3, %v1309_v22, -inf }
0x1021   :  { %1319 = vmax.xlane.f32.xlu0 %v1318_v24  ;;  %v1312_v11 = vpop.f32.mrb[38].mxu0 }
0x1022   :  { %v2953_v26 = vpop.f32.mrb[39].mxu0 }
0x10ac   :  { %v1317_v27 = vpop.xlane.xlu1 %1316 }
0x10ad   :  { %v1321_v29 = vsub.f32 %v1259_v12, %v1317_v27 }
0x10ae   :  { %v1320_v30 = vpop.xlane.xlu0 %1319 }
0x10af   :  { %v1323_v31 = vmul.f32 1.442695, %v1321_v29  ;;  %v1322_v32 = vsub.f32 %v1309_v22, %v1320_v30  ;;  %v3140_v30 = vld [vmem:[#allocation5 + $0x44] ss:$16 sps:$4 sm:$0xff]  }
0x10b1   :  { %3191 = vpow2.f32 %v1323_v31  ;;  %v1325_v33 = vmul.f32 1.442695, %v1322_v32 }
0x10b3   :  { %3193 = vpow2.f32 %v1325_v33 }
0x10bb   :  { %v3192_v34 = vpop.eup %3191 }
0x10bc   :  { %v1327_v15 = vsel %vm310_vm3, %v3192_v34, 0.0 }
0x10bd   :  { %v3194_v16 = vpop.eup %3193  ;;  %1328 = vadd.xlane.f32.xlu0 %v1327_v15 }
0x10be   :  { %v1330_v35 = vsel %vm310_vm3, %v3194_v16, 0.0 }
0x10bf   :  { %1331 = vadd.xlane.f32.xlu1 %v1330_v35 }
0x10d0   :  { %1387 = vrot.lane.b32.xlu1 %v3651_v7, %s3368_s15 }
0x10d3   :  { %1339 = vrot.lane.b32.xlu0 %v3649_v4, %s3368_s15 }
0x114a   :  { %v1329_v36 = vpop.xlane.xlu0 %1328 }
0x114b   :  { %3195 = vrcp.f32 %v1329_v36 }
0x114c   :  { %v1332_v37 = vpop.xlane.xlu1 %1331 }
0x114d   :  { %3197 = vrcp.f32 %v1332_v37 }
0x114e   :  { %v1340_v38 = vpop.permute.xlu0 %1339 }
0x114f   :  { %v1345_v39 = vsel %vm340_vm4, %v1340_v38, 0 }
0x1150   :  { %v1388_v40 = vpop.permute.xlu1 %1387  ;;  %2955 = vmatpush3.bf16.msra.mxu1 %v1345_v39 }
0x1151   :  { %v1393_v41 = vsel %vm340_vm4, %v1388_v40, 0  ;;  %2966 = vmatprep.subr.bf16.mxu1 %v3362_v0 }
0x1152   :  { %2961 = vmatpush3.bf16.msra.mxu0 %v1393_v41 }
0x1153   :  { %2974 = vmatprep.subr.bf16.mxu0 %v3362_v0 }
0x1155   :  { %v3196_v7 = vpop.eup %3195 }
0x1156   :  { %v1335_v42 = vmul.f32 %v3196_v7, %v3192_v34 }
0x1157   :  { %v3198_v43 = vpop.eup %3197 }
0x1158   :  { %v1336_v4 = vmul.f32 %v3198_v43, %v3194_v16  ;;  %v1337_v44 = vpack.c.bf16 %v1335_v42, %v1335_v42 }
0x115a   :  { %2957 = vmatmul.mubr.msk.bf16.vlgmr.msra.gmra.mrb[40].mxu1 %vm310_vm3, %v1337_v44  ;;  %v1338_v28 = vpack.c.bf16 %v1336_v4, %v1336_v4  ;;  %v1541_v44 = vrot.slane %v3634_v53, %v3598_v46 }
0x115b   :  { %2970 = vmatprep.mubr.msk.bf16.mxu1 %vm3363_vm0, %v3362_v0  ;;  %2967 = vmatpush3.bf16.msra.mxu1 %v3136_v45 }
0x115c   :  { %2963 = vmatmul.mubr.msk.bf16.vlgmr.msra.gmra.mrb[40].mxu0 %vm310_vm3, %v1338_v28  ;;  %2968 = vmatprep.subr.bf16.mxu1 %v3362_v0 }
0x115d   :  { %2978 = vmatprep.mubr.msk.bf16.mxu0 %vm3363_vm0, %v3362_v0  ;;  %2975 = vmatpush3.bf16.msra.mxu0 %v3140_v30 }
0x115e   :  { %2976 = vmatprep.subr.bf16.mxu0 %v3362_v0 }
0x115f   :  { %2969 = vmatpush3.bf16.msra.mxu1 %v3138_v47 }
0x1160   :  { %2982 = vmatprep.subr.bf16.mxu1 %v3362_v0 }
0x122d   :  { %v1381_v50 = vpop.f32.mrb[40].mxu1 }
0x122e   :  { %v2958_v51 = vpop.f32.mrb[41].mxu1 }
0x122f   :  { %v1384_v52 = vpop.f32.mrb[42].mxu1  ;;  %v1429_v54 = vpop.f32.mrb[40].mxu0  ;;  %v1547_v51 = vrot.slane %v3634_v53, %v3603_v49 }
0x1230   :  { %v3107_v25 = vpack.i.bf16 %v1429_v54, %v1381_v50  ;;  %v2959_v55 = vpop.f32.mrb[43].mxu1  ;;  %v2964_v56 = vpop.f32.mrb[41].mxu0 }
0x1231   :  { %v1432_v57 = vpop.f32.mrb[42].mxu0  ;;  %v3143_v56 = vld [vmem:[#allocation5 + $0x68] ss:$16 sps:$4 sm:$0xff]  }
0x1232   :  { %3108 = vrot.lane.b32.xlu1 %v3107_v25, %s3356_s26  ;;  %v2965_v58 = vpop.f32.mrb[43].mxu0  ;;  %v1554_v57 = vrot.slane %v3634_v53, %v3612_v61 }
0x12a4   :  { %v3109_v59 = vpop.permute.xlu1 %3108 }
0x12a5   :  { %v3111_v10 = vunpack.i.h.bf16 %v3109_v59  ;;  %v3110_v63 = vunpack.i.l.bf16 %v3109_v59 }
0x12a7   :  { %v1444_v2 = vsel %vm95_vm1, %v3707_v1, %v3111_v10  ;;  %v1443_v3 = vsel %vm95_vm1, %v3705_v62, %v3110_v63 }
0x12a8   :  { %v1445_v5 = vpack.c.bf16 %v1444_v2, %v1443_v3 }
0x12aa   :  { %2971 = vmatmul.mubr.msk.bf16.vlgmr.msra.gmra.mrb[44].mxu1 %vm165_vm2, %v1445_v5 }
0x12ab   :  { %2986 = vmatprep.mubr.msk.bf16.mxu1 %vm3363_vm0, %v3362_v0 }
0x137d   :  { %v1499_v12 = vpop.f32.mrb[44].mxu1 }
0x137e   :  { %v1500_v18 = vadd.f32 %v1499_v12, %v1449_v6  ;;  %v2972_v20 = vpop.f32.mrb[45].mxu1 }
0x137f   :  { %v1502_v21 = vpop.f32.mrb[46].mxu1 }
0x1380   :  { %v1506_v22 = vadd.f32 %v1500_v18, %v3638_v60  ;;  %v1503_v23 = vadd.f32 %v1502_v21, %v1449_v6  ;;  %v2973_v1 = vpop.f32.mrb[47].mxu1  ;;  %v3141_v60 = vld [vmem:[#allocation5 + $0x64] ss:$16 sps:$4 sm:$0xff]   ;;  %v1613_v18 = vrot.slane %v3634_v53, %v3619_v13 }
0x1381   :  { %2977 = vmatpush3.bf16.msra.mxu0 %v3141_v60 }
0x1382   :  { %v1507_v17 = vadd.f32 %v1503_v23, %v3640_v8  ;;  %v1508_v62 = vsel %vm165_vm2, %v1506_v22, 0.0  ;;  %v1516_v24 = vmul.f32 %v1506_v22, %v1506_v22  ;;  %2990 = vmatprep.subr.bf16.mxu0 %v3362_v0  ;;  %v3142_v8 = vld [vmem:[#allocation5 + $0x48] ss:$16 sps:$4 sm:$0xff]  }
0x1383   :  { %1509 = vadd.xlane.f32.xlu0 %v1508_v62  ;;  %2983 = vmatpush3.bf16.xpose.msra.mxu1 %v3142_v8  ;;  %v3144_v8 = vld [vmem:[#allocation5 + $0x80] ss:$16 sps:$4 sm:$0xff]  }
0x1384   :  { %v1511_v11 = vsel %vm165_vm2, %v1507_v17, 0.0  ;;  %v1518_v26 = vsel %vm165_vm2, %v1516_v24, 0.0  ;;  %v1517_v27 = vmul.f32 %v1507_v17, %v1507_v17  ;;  %2984 = vmatprep.subr.bf16.mxu1 %v3362_v0 }
0x1385   :  { %1512 = vadd.xlane.f32.xlu1 %v1511_v11 }
0x1386   :  { %v1521_v29 = vsel %vm165_vm2, %v1517_v27, 0.0 }
0x1387   :  { %1519 = vadd.xlane.f32.xlu0 %v1518_v26 }
0x138b   :  { %1522 = vadd.xlane.f32.xlu0 %v1521_v29  ;;  %2985 = vmatpush3.bf16.xpose.msra.mxu1 %v3143_v56 }
0x138c   :  { %3004 = vmatprep.subr.bf16.mxu1 %v3362_v0 }
0x1410   :  { %v1510_v31 = vpop.xlane.xlu0 %1509 }
0x1411   :  { %v1514_v32 = vmul.f32 0.03125, %v1510_v31  ;;  %v3146_v31 = vld [vmem:[#allocation5 + $0xa0] ss:$16 sps:$4 sm:$0xff]  }
0x1412   :  { %v1513_v33 = vpop.xlane.xlu1 %1512 }
0x1413   :  { %v1526_v15 = vmul.f32 %v1514_v32, %v1514_v32  ;;  %v1515_v16 = vmul.f32 0.03125, %v1513_v33  ;;  %v1530_v42 = vsub.f32 %v1506_v22, %v1514_v32 }
0x1414   :  { %v1520_v34 = vpop.xlane.xlu0 %1519 }
0x1415   :  { %v1524_v35 = vmul.f32 0.03125, %v1520_v34  ;;  %v1527_v38 = vmul.f32 %v1515_v16, %v1515_v16  ;;  %v1531_v28 = vsub.f32 %v1507_v17, %v1515_v16 }
0x1417   :  { %v1528_v36 = vsub.f32 %v1524_v35, %v1526_v15 }
0x1418   :  { %v1523_v37 = vpop.xlane.xlu0 %1522 }
0x1419   :  { %v1532_v39 = vadd.f32 1e-05, %v1528_v36  ;;  %v1525_v40 = vmul.f32 0.03125, %v1523_v37 }
0x141b   :  { %3199 = vrsqrt.f32 %v1532_v39  ;;  %v1529_v41 = vsub.f32 %v1525_v40, %v1527_v38 }
0x141d   :  { %v1533_v7 = vadd.f32 1e-05, %v1529_v41 }
0x141f   :  { %3201 = vrsqrt.f32 %v1533_v7 }
0x1425   :  { %v3200_v43 = vpop.eup %3199 }
0x1426   :  { %v1536_v4 = vmul.f32 %v3200_v43, %v1530_v42 }
0x1428   :  { %v1542_v50 = vmul.f32 %v1541_v44, %v1536_v4  ;;  %v1698_v4 = vrot.slane %v3634_v53, %v3630_v48 }
0x1429   :  { %v3202_v45 = vpop.eup %3201 }
0x142a   :  { %v1537_v47 = vmul.f32 %v3202_v45, %v1531_v28  ;;  %v1548_v54 = vadd.f32 %v1547_v51, %v1542_v50  ;;  %v3770_v28 = vld [vmem:[#allocation8 + $0x10] sm:$0xff] }
0x142b   :  { %v1720_v53 = vrot.slane %v3770_v28, %v3491_v19 }
0x142c   :  { %v1543_v52 = vmul.f32 %v1541_v44, %v1537_v47 }
0x142e   :  { %v1549_v25 = vadd.f32 %v1547_v51, %v1543_v52 }
0x1430   :  { %v1550_v55 = vpack.c.bf16 %v1549_v25, %v1548_v54 }
0x1432   :  { %2979 = vmatmul.mubr.msk.bf16.vlgmr.msra.gmra.mrb[44].mxu0 %vm165_vm2, %v1550_v55 }
0x1433   :  { %2994 = vmatprep.mubr.msk.bf16.mxu0 %vm3363_vm0, %v3362_v0  ;;  %2991 = vmatpush3.bf16.msra.mxu0 %v3144_v8 }
0x1434   :  { %2992 = vmatprep.subr.bf16.mxu0 %v3362_v0 }
0x1437   :  { %2993 = vmatpush3.bf16.msra.mxu0 %v3146_v31 }
0x1438   :  { %2998 = vmatprep.subr.bf16.mxu0 %v3362_v0 }
0x1505   :  { %v1600_v58 = vpop.f32.mrb[44].mxu0 }
0x1506   :  { %v1601_v59 = vadd.f32 %v1600_v58, %v1554_v57  ;;  %v2980_v10 = vpop.f32.mrb[45].mxu0 }
0x1507   :  { %v1603_v63 = vpop.f32.mrb[46].mxu0 }
0x1508   :  { %v1604_v2 = vadd.f32 %v1603_v63, %v1554_v57  ;;  %v2981_v3 = vpop.f32.mrb[47].mxu0  ;;  %v1607_v5 = vmax.f32 %v1601_v59, 0.0 }
0x150a   :  { %v1608_v6 = vmax.f32 %v1604_v2, 0.0 }
0x150c   :  { %v1609_v12 = vpack.c.bf16 %v1608_v6, %v1607_v5 }
0x150e   :  { %2987 = vmatmul.mubr.bf16.vlgmr.msra.gmra.mrb[48].mxu1 %v1609_v12 }
0x150f   :  { %3006 = vmatprep.mubr.msk.bf16.mxu1 %vm3363_vm0, %v3362_v0 }
0x15e1   :  { %v1656_v20 = vpop.f32.mrb[48].mxu1 }
0x15e2   :  { %v1657_v21 = vadd.f32 %v1656_v20, %v1613_v18  ;;  %v2988_v22 = vpop.f32.mrb[49].mxu1 }
0x15e3   :  { %v1659_v23 = vpop.f32.mrb[50].mxu1 }
0x15e4   :  { %v1663_v1 = vadd.f32 %v1657_v21, %v1548_v54  ;;  %v1660_v17 = vadd.f32 %v1659_v23, %v1613_v18  ;;  %v2989_v62 = vpop.f32.mrb[51].mxu1  ;;  %v1704_v54 = vrot.slane %v3770_v28, %v3475_v9 }
0x15e6   :  { %v1664_v24 = vadd.f32 %v1660_v17, %v1549_v25  ;;  %v1665_v11 = vsel %vm165_vm2, %v1663_v1, 0.0  ;;  %v1673_v26 = vmul.f32 %v1663_v1, %v1663_v1 }
0x15e7   :  { %1666 = vadd.xlane.f32.xlu1 %v1665_v11 }
0x15e8   :  { %v1668_v27 = vsel %vm165_vm2, %v1664_v24, 0.0  ;;  %v1674_v29 = vmul.f32 %v1664_v24, %v1664_v24  ;;  %v1675_v30 = vsel %vm165_vm2, %v1673_v26, 0.0 }
0x15e9   :  { %1669 = vadd.xlane.f32.xlu0 %v1668_v27 }
0x15ea   :  { %v1678_v60 = vsel %vm165_vm2, %v1674_v29, 0.0 }
0x15eb   :  { %1676 = vadd.xlane.f32.xlu1 %v1675_v30 }
0x15ed   :  { %1679 = vadd.xlane.f32.xlu0 %v1678_v60 }
0x1674   :  { %v1667_v32 = vpop.xlane.xlu1 %1666 }
0x1675   :  { %v1671_v33 = vmul.f32 0.03125, %v1667_v32 }
0x1676   :  { %v1670_v34 = vpop.xlane.xlu0 %1669 }
0x1677   :  { %v1672_v15 = vmul.f32 0.03125, %v1670_v34  ;;  %v1683_v35 = vmul.f32 %v1671_v33, %v1671_v33  ;;  %v1687_v43 = vsub.f32 %v1663_v1, %v1671_v33 }
0x1678   :  { %v1677_v16 = vpop.xlane.xlu1 %1676 }
0x1679   :  { %v1681_v36 = vmul.f32 0.03125, %v1677_v16  ;;  %v1684_v38 = vmul.f32 %v1672_v15, %v1672_v15  ;;  %v1688_v45 = vsub.f32 %v1664_v24, %v1672_v15 }
0x167a   :  { %v1680_v37 = vpop.xlane.xlu0 %1679 }
0x167b   :  { %v1685_v39 = vsub.f32 %v1681_v36, %v1683_v35  ;;  %v1682_v40 = vmul.f32 0.03125, %v1680_v37 }
0x167d   :  { %v1689_v41 = vadd.f32 1e-05, %v1685_v39  ;;  %v1686_v7 = vsub.f32 %v1682_v40, %v1684_v38 }
0x167f   :  { %3203 = vrsqrt.f32 %v1689_v41  ;;  %v1690_v42 = vadd.f32 1e-05, %v1686_v7 }
0x1681   :  { %3205 = vrsqrt.f32 %v1690_v42 }
0x1689   :  { %v3204_v44 = vpop.eup %3203 }
0x168a   :  { %v1693_v47 = vmul.f32 %v3204_v44, %v1687_v43 }
0x168b   :  { %v3206_v50 = vpop.eup %3205 }
0x168c   :  { %v1694_v51 = vmul.f32 %v3206_v50, %v1688_v45  ;;  %v1699_v52 = vmul.f32 %v1698_v4, %v1693_v47 }
0x168e   :  { %v1700_v25 = vmul.f32 %v1698_v4, %v1694_v51  ;;  %v3774_v55 = vadd.f32 %v1704_v54, %v1699_v52 }
0x1690   :  { %v3776_v56 = vadd.f32 %v1704_v54, %v1700_v25 }
0x1692   :  { %v1716_v57 = vpack.c.bf16 %v3776_v56, %v3774_v55 }
0x1694   :  { %2995 = vmatmul.mubr.msk.bf16.vlgmr.msra.gmra.mrb[48].mxu0 %vm165_vm2, %v1716_v57 }
0x1695   :  { %3000 = vmatprep.mubr.msk.bf16.mxu0 %vm3363_vm0, %v3362_v0 }
0x1767   :  { %v1770_v58 = vpop.f32.mrb[48].mxu0 }
0x1768   :  { %v1771_v59 = vadd.f32 %v1770_v58, %v1720_v53  ;;  %v2996_v10 = vpop.f32.mrb[49].mxu0 }
0x1769   :  { %v1773_v63 = vpop.f32.mrb[50].mxu0 }
0x176a   :  { %v3785_v2 = vpack.c.bf16 %v1771_v59, %v1771_v59  ;;  %v1774_v3 = vadd.f32 %v1773_v63, %v1720_v53  ;;  %v2997_v5 = vpop.f32.mrb[51].mxu0 }
0x176c   :  { %v3787_v6 = vpack.c.bf16 %v1774_v3, %v1774_v3  ;;  %1780 = vrot.lane.b32.xlu1 %v3785_v2, %s3364_s3 }
0x176e   :  { %1829 = vrot.lane.b32.xlu0 %v3787_v6, %s3364_s3 }
0x17de   :  { %v1781_v12 = vpop.permute.xlu1 %1780 }
0x17df   :  { %v1786_v18 = vsel %vm95_vm1, %v1781_v12, 0 }
0x17e0   :  { %2999 = vmatpush3.bf16.xpose.msra.mxu0 %v1786_v18  ;;  %v1830_v20 = vpop.permute.xlu0 %1829 }
0x17e1   :  { %v1835_v21 = vsel %vm95_vm1, %v1830_v20, 0  ;;  %3010 = vmatprep.subr.bf16.mxu0 %v3362_v0 }
0x17e2   :  { %3005 = vmatpush3.bf16.xpose.msra.mxu1 %v1835_v21 }
0x17e3   :  { %3016 = vmatprep.subr.bf16.mxu1 %v3362_v0 }
0x17e7   :  { %3001 = vmatmul.mubr.msk.bf16.vlgmr.msra.gmra.mrb[52].mxu0 %vm95_vm1, %v3785_v2 }
0x17e8   :  { %3012 = vmatprep.mubr.msk.bf16.mxu0 %vm3363_vm0, %v3362_v0 }
0x17e9   :  { %3007 = vmatmul.mubr.msk.bf16.vlgmr.msra.gmra.mrb[52].mxu1 %vm95_vm1, %v3787_v6 }
0x17ea   :  { %3018 = vmatprep.mubr.msk.bf16.mxu1 %vm3363_vm0, %v3362_v0 }
0x18ba   :  { %v1822_v22 = vpop.f32.mrb[52].mxu0 }
0x18bb   :  { %v3002_v23 = vpop.f32.mrb[53].mxu0  ;;  %v1877_v1 = vsel %vm310_vm3, %v1822_v22, -inf }
0x18bc   :  { %v1871_v17 = vpop.f32.mrb[52].mxu1  ;;  %1878 = vmax.xlane.f32.xlu1 %v1877_v1  ;;  %v1825_v62 = vpop.f32.mrb[54].mxu0 }
0x18bd   :  { %v3003_v24 = vpop.f32.mrb[55].mxu0  ;;  %v3008_v11 = vpop.f32.mrb[53].mxu1  ;;  %v1880_v26 = vsel %vm310_vm3, %v1871_v17, -inf }
0x18be   :  { %1881 = vmax.xlane.f32.xlu0 %v1880_v26  ;;  %v1874_v27 = vpop.f32.mrb[54].mxu1 }
0x18bf   :  { %v3009_v29 = vpop.f32.mrb[55].mxu1 }
0x18cd   :  { %1901 = vrot.lane.b32.xlu1 %v3785_v2, %s3365_s1 }
0x1949   :  { %v1879_v30 = vpop.xlane.xlu1 %1878 }
0x194a   :  { %v1883_v60 = vsub.f32 %v1822_v22, %v1879_v30 }
0x194b   :  { %v1882_v8 = vpop.xlane.xlu0 %1881 }
0x194c   :  { %v1885_v31 = vmul.f32 1.442695, %v1883_v60  ;;  %v1884_v32 = vsub.f32 %v1871_v17, %v1882_v8 }
0x194d   :  { %v1902_v33 = vpop.permute.xlu1 %1901 }
0x194e   :  { %3207 = vpow2.f32 %v1885_v31  ;;  %v1887_v34 = vmul.f32 1.442695, %v1884_v32  ;;  %v1907_v15 = vsel %vm340_vm4, %v1902_v33, 0 }
0x194f   :  { %3011 = vmatpush3.bf16.msra.mxu0 %v1907_v15 }
0x1950   :  { %3209 = vpow2.f32 %v1887_v34  ;;  %3022 = vmatprep.subr.bf16.mxu0 %v3362_v0 }
0x1958   :  { %v3208_v16 = vpop.eup %3207 }
0x1959   :  { %v1889_v35 = vsel %vm310_vm3, %v3208_v16, 0.0 }
0x195a   :  { %v3210_v36 = vpop.eup %3209  ;;  %1890 = vadd.xlane.f32.xlu1 %v1889_v35 }
0x195b   :  { %v1892_v37 = vsel %vm310_vm3, %v3210_v36, 0.0 }
0x195c   :  { %1893 = vadd.xlane.f32.xlu0 %v1892_v37 }
0x196b   :  { %1999 = vrot.lane.b32.xlu1 %v3785_v2, %s3366_s13 }
0x196f   :  { %2049 = vrot.lane.b32.xlu1 %v3787_v6, %s3366_s13 }
0x1972   :  { %1949 = vrot.lane.b32.xlu0 %v3787_v6, %s3365_s1 }
0x1973   :  { %2047 = vrot.lane.b32.xlu1 %v3787_v6, %s3367_s14 }
0x1976   :  { %1997 = vrot.lane.b32.xlu0 %v3785_v2, %s3367_s14 }
0x19e7   :  { %v1891_v38 = vpop.xlane.xlu1 %1890 }
0x19e8   :  { %3211 = vrcp.f32 %v1891_v38 }
0x19e9   :  { %v1894_v39 = vpop.xlane.xlu0 %1893 }
0x19ea   :  { %3213 = vrcp.f32 %v1894_v39 }
0x19eb   :  { %v2000_v7 = vpop.permute.xlu1 %1999 }
0x19ec   :  { %v2005_v50 = vsel %vm95_vm1, %v2000_v7, 0  ;;  %v3148_v7 = vld [vmem:[#allocation5 + $0x8c] ss:$16 sps:$4 sm:$0xff]  }
0x19ed   :  { %v1950_v40 = vpop.permute.xlu0 %1949 }
0x19ee   :  { %v1955_v41 = vsel %vm340_vm4, %v1950_v40, 0 }
0x19ef   :  { %3017 = vmatpush3.bf16.msra.mxu1 %v1955_v41  ;;  %v2050_v47 = vpop.permute.xlu1 %2049 }
0x19f0   :  { %3028 = vmatprep.subr.bf16.mxu1 %v3362_v0  ;;  %v2055_v52 = vsel %vm95_vm1, %v2050_v47, 0 }
0x19f1   :  { %v1998_v54 = vpop.permute.xlu0 %1997 }
0x19f2   :  { %v3212_v42 = vpop.eup %3211 }
0x19f3   :  { %v1897_v43 = vmul.f32 %v3212_v42, %v3208_v16  ;;  %v2048_v25 = vpop.permute.xlu1 %2047  ;;  %v3150_v42 = vld [vmem:[#allocation5 + $0xac] ss:$16 sps:$4 sm:$0xff]  }
0x19f4   :  { %v3214_v4 = vpop.eup %3213 }
0x19f5   :  { %v1898_v44 = vmul.f32 %v3214_v4, %v3210_v36  ;;  %v1899_v45 = vpack.c.bf16 %v1897_v43, %v1897_v43 }
0x19f7   :  { %3013 = vmatmul.mubr.msk.bf16.vlgmr.msra.gmra.mrb[56].mxu0 %vm310_vm3, %v1899_v45  ;;  %v1900_v51 = vpack.c.bf16 %v1898_v44, %v1898_v44 }
0x19f8   :  { %3023 = vmatpush3.bf16.xpose.msra.mxu0 %v2005_v50  ;;  %3024 = vmatprep.mubr.msk.bf16.mxu0 %vm3363_vm0, %v3362_v0 }
0x19f9   :  { %3019 = vmatmul.mubr.msk.bf16.vlgmr.msra.gmra.mrb[56].mxu1 %vm310_vm3, %v1900_v51  ;;  %3034 = vmatprep.subr.bf16.mxu0 %v3362_v0 }
0x19fa   :  { %3029 = vmatpush3.bf16.xpose.msra.mxu1 %v2055_v52  ;;  %3030 = vmatprep.mubr.msk.bf16.mxu1 %vm3363_vm0, %v3362_v0 }
0x19fb   :  { %3040 = vmatprep.subr.bf16.mxu1 %v3362_v0 }
0x19ff   :  { %3025 = vmatmul.mubr.msk.bf16.vlgmr.msra.gmra.mrb[60].mxu0 %vm95_vm1, %v1998_v54 }
0x1a00   :  { %3036 = vmatprep.mubr.msk.bf16.mxu0 %vm3363_vm0, %v3362_v0 }
0x1a01   :  { %3031 = vmatmul.mubr.msk.bf16.vlgmr.msra.gmra.mrb[60].mxu1 %vm95_vm1, %v2048_v25 }
0x1a02   :  { %3042 = vmatprep.mubr.msk.bf16.mxu1 %vm3363_vm0, %v3362_v0 }
0x1aca   :  { %v3841_v57 = vpop.f32.mrb[56].mxu0 }
0x1acb   :  { %v3014_v53 = vpop.f32.mrb[57].mxu0 }
0x1acc   :  { %v1946_v58 = vpop.f32.mrb[58].mxu0  ;;  %v3843_v59 = vpop.f32.mrb[56].mxu1 }
0x1acd   :  { %v3015_v10 = vpop.f32.mrb[59].mxu0  ;;  %v3020_v63 = vpop.f32.mrb[57].mxu1 }
0x1ace   :  { %v1994_v3 = vpop.f32.mrb[58].mxu1 }
0x1acf   :  { %v3021_v5 = vpop.f32.mrb[59].mxu1 }
0x1ad0   :  { %v2231_v5 = vrot.slane %v3770_v28, %v3586_v14 }
0x1ad2   :  { %v2041_v12 = vpop.f32.mrb[60].mxu0 }
0x1ad3   :  { %v3026_v18 = vpop.f32.mrb[61].mxu0  ;;  %v2097_v20 = vsel %vm310_vm3, %v2041_v12, -inf }
0x1ad4   :  { %v2091_v21 = vpop.f32.mrb[60].mxu1  ;;  %2098 = vmax.xlane.f32.xlu0 %v2097_v20  ;;  %v2044_v22 = vpop.f32.mrb[62].mxu0 }
0x1ad5   :  { %v3027_v23 = vpop.f32.mrb[63].mxu0  ;;  %v3032_v1 = vpop.f32.mrb[61].mxu1  ;;  %v2100_v17 = vsel %vm310_vm3, %v2091_v21, -inf }
0x1ad6   :  { %2101 = vmax.xlane.f32.xlu1 %v2100_v17  ;;  %v2094_v62 = vpop.f32.mrb[62].mxu1 }
0x1ad7   :  { %v3033_v24 = vpop.f32.mrb[63].mxu1 }
0x1ae7   :  { %2121 = vrot.lane.b32.xlu1 %v3785_v2, %s3368_s15 }
0x1b61   :  { %v2099_v11 = vpop.xlane.xlu0 %2098 }
0x1b62   :  { %v2103_v26 = vsub.f32 %v2041_v12, %v2099_v11 }
0x1b63   :  { %v2102_v27 = vpop.xlane.xlu1 %2101 }
0x1b64   :  { %v2105_v29 = vmul.f32 1.442695, %v2103_v26  ;;  %v2104_v30 = vsub.f32 %v2091_v21, %v2102_v27  ;;  %v3152_v27 = vld [vmem:[#allocation5 + $0x84] ss:$16 sps:$4 sm:$0xff]  }
0x1b66   :  { %3215 = vpow2.f32 %v2105_v29  ;;  %v2107_v60 = vmul.f32 1.442695, %v2104_v30 }
0x1b67   :  { %v2122_v8 = vpop.permute.xlu1 %2121 }
0x1b68   :  { %3217 = vpow2.f32 %v2107_v60  ;;  %v2127_v31 = vsel %vm340_vm4, %v2122_v8, 0 }
0x1b69   :  { %3035 = vmatpush3.bf16.msra.mxu0 %v2127_v31 }
0x1b6a   :  { %3046 = vmatprep.subr.bf16.mxu0 %v3362_v0 }
0x1b70   :  { %v3216_v32 = vpop.eup %3215 }
0x1b71   :  { %v2109_v33 = vsel %vm310_vm3, %v3216_v32, 0.0 }
0x1b72   :  { %v3218_v34 = vpop.eup %3217  ;;  %2110 = vadd.xlane.f32.xlu0 %v2109_v33 }
0x1b73   :  { %v2112_v2 = vsel %vm310_vm3, %v3218_v34, 0.0 }
0x1b76   :  { %2113 = vadd.xlane.f32.xlu0 %v2112_v2 }
0x1b8c   :  { %2169 = vrot.lane.b32.xlu0 %v3787_v6, %s3368_s15 }
0x1bff   :  { %v2111_v15 = vpop.xlane.xlu0 %2110 }
0x1c00   :  { %3219 = vrcp.f32 %v2111_v15 }
0x1c03   :  { %v2114_v16 = vpop.xlane.xlu0 %2113 }
0x1c04   :  { %3221 = vrcp.f32 %v2114_v16 }
0x1c07   :  { %v2170_v35 = vpop.permute.xlu0 %2169 }
0x1c08   :  { %v2175_v36 = vsel %vm340_vm4, %v2170_v35, 0 }
0x1c09   :  { %3041 = vmatpush3.bf16.msra.mxu1 %v2175_v36 }
0x1c0a   :  { %v3220_v37 = vpop.eup %3219  ;;  %3054 = vmatprep.subr.bf16.mxu1 %v3362_v0 }
0x1c0b   :  { %v2117_v38 = vmul.f32 %v3220_v37, %v3216_v32 }
0x1c0d   :  { %v2119_v39 = vpack.c.bf16 %v2117_v38, %v2117_v38 }
0x1c0e   :  { %v3222_v40 = vpop.eup %3221 }
0x1c0f   :  { %v2118_v41 = vmul.f32 %v3222_v40, %v3218_v34  ;;  %3037 = vmatmul.mubr.msk.bf16.vlgmr.msra.gmra.mrb[64].mxu0 %vm310_vm3, %v2119_v39  ;;  %v2323_v39 = vrot.slane %v3770_v28, %v3598_v46  ;;  %v2336_v46 = vrot.slane %v3770_v28, %v3612_v61 }
0x1c10   :  { %3050 = vmatprep.mubr.msk.bf16.mxu0 %vm3363_vm0, %v3362_v0  ;;  %3047 = vmatpush3.bf16.msra.mxu0 %v3148_v7 }
0x1c11   :  { %v2120_v6 = vpack.c.bf16 %v2118_v41, %v2118_v41  ;;  %3048 = vmatprep.subr.bf16.mxu0 %v3362_v0 }
0x1c13   :  { %3043 = vmatmul.mubr.msk.bf16.vlgmr.msra.gmra.mrb[64].mxu1 %vm310_vm3, %v2120_v6 }
0x1c14   :  { %3058 = vmatprep.mubr.msk.bf16.mxu1 %vm3363_vm0, %v3362_v0  ;;  %3049 = vmatpush3.bf16.msra.mxu0 %v3150_v42 }
0x1c15   :  { %3062 = vmatprep.subr.bf16.mxu0 %v3362_v0  ;;  %3055 = vmatpush3.bf16.msra.mxu1 %v3152_v27 }
0x1c16   :  { %3056 = vmatprep.subr.bf16.mxu1 %v3362_v0 }
0x1ce2   :  { %v2163_v43 = vpop.f32.mrb[64].mxu0 }
0x1ce3   :  { %v3038_v4 = vpop.f32.mrb[65].mxu0 }
0x1ce4   :  { %v2166_v44 = vpop.f32.mrb[66].mxu0  ;;  %v2329_v4 = vrot.slane %v3770_v28, %v3603_v49 }
0x1ce5   :  { %v3039_v45 = vpop.f32.mrb[67].mxu0 }
0x1ce6   :  { %v2211_v47 = vpop.f32.mrb[64].mxu1 }
0x1ce7   :  { %v3112_v50 = vpack.i.bf16 %v2211_v47, %v2163_v43  ;;  %v3044_v51 = vpop.f32.mrb[65].mxu1 }
0x1ce8   :  { %v2214_v52 = vpop.f32.mrb[66].mxu1  ;;  %v3155_v51 = vld [vmem:[#allocation5 + $0xa8] ss:$16 sps:$4 sm:$0xff]  }
0x1ce9   :  { %v3045_v54 = vpop.f32.mrb[67].mxu1  ;;  %3113 = vrot.lane.b32.xlu1 %v3112_v50, %s3356_s26  ;;  %s3369_s26 = smov [#allocation10]  }
0x1cea   :  { %s2657_s16 = sshll.u32 %s3369_s26, 4  ;;  %s2658_s16 = int_to_ptr.vmem [resolvable:$true] %s2657_s16 }
0x1ceb   :  { %s3324_s17 = scalar_lea.vmem %s2658_s16, 128  ;;  %p3329_p5 = scmp.lt.s32.totalorder %s2658_s16, %s2658_s16 }
0x1cec   :  { %p3325_p4 = scmp.ne.s32.totalorder %s2658_s16, %s3324_s17  ;;  %p3330_p6 = scmp.lt.s32.totalorder %s3324_s17, %s3324_s17 }
0x1cee   :  { %p3331_p7 = por %p3330_p6, %p3329_p5 }
0x1cf0   :  { %p3332_p8 = pnand %p3331_p7, %p3325_p4 }
0x1d5b   :  { %v3114_v25 = vpop.permute.xlu1 %3113 }
0x1d5c   :  { %v3116_v53 = vunpack.i.h.bf16 %v3114_v25  ;;  %v3115_v58 = vunpack.i.l.bf16 %v3114_v25 }
0x1d5e   :  { %v2226_v10 = vsel %vm95_vm1, %v3843_v59, %v3116_v53  ;;  %v2225_v63 = vsel %vm95_vm1, %v3841_v57, %v3115_v58 }
0x1d5f   :  { %v2227_v3 = vpack.c.bf16 %v2226_v10, %v2225_v63 }
0x1d61   :  { %3051 = vmatmul.mubr.msk.bf16.vlgmr.msra.gmra.mrb[68].mxu0 %vm165_vm2, %v2227_v3 }
0x1d62   :  { %3066 = vmatprep.mubr.msk.bf16.mxu0 %vm3363_vm0, %v3362_v0 }
0x1e34   :  { %v2281_v12 = vpop.f32.mrb[68].mxu0 }
0x1e35   :  { %v2282_v18 = vadd.f32 %v2281_v12, %v2231_v5  ;;  %v3052_v20 = vpop.f32.mrb[69].mxu0 }
0x1e36   :  { %v2284_v21 = vpop.f32.mrb[70].mxu0 }
0x1e37   :  { %v2288_v22 = vadd.f32 %v2282_v18, %v3774_v55  ;;  %v2285_v23 = vadd.f32 %v2284_v21, %v2231_v5  ;;  %v3053_v59 = vpop.f32.mrb[71].mxu0  ;;  %v3153_v55 = vld [vmem:[#allocation5 + $0xa4] ss:$16 sps:$4 sm:$0xff]   ;;  %v2395_v5 = vrot.slane %v3770_v28, %v3619_v13 }
0x1e38   :  { %3057 = vmatpush3.bf16.msra.mxu1 %v3153_v55 }
0x1e39   :  { %v2289_v1 = vadd.f32 %v2285_v23, %v3776_v56  ;;  %v2290_v57 = vsel %vm165_vm2, %v2288_v22, 0.0  ;;  %v2298_v24 = vmul.f32 %v2288_v22, %v2288_v22  ;;  %3070 = vmatprep.subr.bf16.mxu1 %v3362_v0  ;;  %v3154_v56 = vld [vmem:[#allocation5 + $0x88] ss:$16 sps:$4 sm:$0xff]  }
0x1e3a   :  { %2291 = vadd.xlane.f32.xlu1 %v2290_v57  ;;  %3063 = vmatpush3.bf16.xpose.msra.mxu0 %v3154_v56 }
0x1e3b   :  { %v2293_v17 = vsel %vm165_vm2, %v2289_v1, 0.0  ;;  %v2299_v62 = vmul.f32 %v2289_v1, %v2289_v1  ;;  %v2300_v26 = vsel %vm165_vm2, %v2298_v24, 0.0  ;;  %3064 = vmatprep.subr.bf16.mxu0 %v3362_v0 }
0x1e3c   :  { %2294 = vadd.xlane.f32.xlu0 %v2293_v17 }
0x1e3d   :  { %v2303_v11 = vsel %vm165_vm2, %v2299_v62, 0.0 }
0x1e3e   :  { %2304 = vadd.xlane.f32.xlu1 %v2303_v11  ;;  %v3156_v11 = vld [vmem:[#allocation7 + $0x14] ss:$8 sps:$4 sm:$0xff]  }
0x1e40   :  { %2301 = vadd.xlane.f32.xlu0 %v2300_v26  ;;  %v3235_v26 = vld [vmem:[#allocation7 + $0x4] ss:$8 sps:$4 sm:$0xff]  }
0x1e42   :  { %3065 = vmatpush3.bf16.xpose.msra.mxu0 %v3155_v51 }
0x1ec7   :  { %v2292_v29 = vpop.xlane.xlu1 %2291 }
0x1ec8   :  { %v2296_v60 = vmul.f32 0.03125, %v2292_v29 }
0x1ec9   :  { %v2295_v30 = vpop.xlane.xlu0 %2294 }
0x1eca   :  { %v2297_v8 = vmul.f32 0.03125, %v2295_v30  ;;  %v2308_v2 = vmul.f32 %v2296_v60, %v2296_v60  ;;  %v2312_v41 = vsub.f32 %v2288_v22, %v2296_v60 }
0x1ecb   :  { %v2305_v31 = vpop.xlane.xlu1 %2304 }
0x1ecc   :  { %v2309_v32 = vmul.f32 %v2297_v8, %v2297_v8  ;;  %v2307_v33 = vmul.f32 0.03125, %v2305_v31  ;;  %v2313_v38 = vsub.f32 %v2289_v1, %v2297_v8 }
0x1ecd   :  { %v2302_v34 = vpop.xlane.xlu0 %2301 }
0x1ece   :  { %v2311_v15 = vsub.f32 %v2307_v33, %v2309_v32  ;;  %v2306_v16 = vmul.f32 0.03125, %v2302_v34 }
0x1ed0   :  { %v2315_v35 = vadd.f32 1e-05, %v2311_v15  ;;  %v2310_v36 = vsub.f32 %v2306_v16, %v2308_v2 }
0x1ed2   :  { %3223 = vrsqrt.f32 %v2315_v35  ;;  %v2314_v37 = vadd.f32 1e-05, %v2310_v36 }
0x1ed4   :  { %3225 = vrsqrt.f32 %v2314_v37  ;;  %v3903_v37 = vld [vmem:[#allocation8 + $0x18] sm:$0xff] }
0x1edc   :  { %v3224_v40 = vpop.eup %3223 }
0x1edd   :  { %v2319_v6 = vmul.f32 %v3224_v40, %v2313_v38 }
0x1ede   :  { %v3226_v7 = vpop.eup %3225 }
0x1edf   :  { %v2318_v42 = vmul.f32 %v3226_v7, %v2312_v41  ;;  %v2325_v43 = vmul.f32 %v2323_v39, %v2319_v6  ;;  %v2486_v41 = vrot.slane %v3903_v37, %v3475_v9 }
0x1ee1   :  { %v2324_v44 = vmul.f32 %v2323_v39, %v2318_v42  ;;  %v2331_v47 = vadd.f32 %v2329_v4, %v2325_v43  ;;  %v2480_v39 = vrot.slane %v3770_v28, %v3630_v48 }
0x1ee3   :  { %v2330_v45 = vadd.f32 %v2329_v4, %v2324_v44 }
0x1ee5   :  { %v2332_v50 = vpack.c.bf16 %v2331_v47, %v2330_v45 }
0x1ee7   :  { %3059 = vmatmul.mubr.msk.bf16.vlgmr.msra.gmra.mrb[68].mxu1 %vm165_vm2, %v2332_v50 }
0x1ee8   :  { %3074 = vmatprep.mubr.msk.bf16.mxu1 %vm3363_vm0, %v3362_v0 }
0x1fba   :  { %v2382_v52 = vpop.f32.mrb[68].mxu1 }
0x1fbb   :  { %v2383_v54 = vadd.f32 %v2382_v52, %v2336_v46  ;;  %v3060_v25 = vpop.f32.mrb[69].mxu1 }
0x1fbc   :  { %v2385_v53 = vpop.f32.mrb[70].mxu1 }
0x1fbd   :  { %v2386_v58 = vadd.f32 %v2385_v53, %v2336_v46  ;;  %v3061_v49 = vpop.f32.mrb[71].mxu1  ;;  %v2389_v10 = vmax.f32 %v2383_v54, 0.0 }
0x1fbf   :  { %v2390_v63 = vmax.f32 %v2386_v58, 0.0 }
0x1fc1   :  { %v2391_v3 = vpack.c.bf16 %v2390_v63, %v2389_v10 }
0x1fc3   :  { %3067 = vmatmul.mubr.bf16.vlgmr.msra.gmra.mrb[72].mxu0 %v2391_v3 }
0x2096   :  { %v2438_v12 = vpop.f32.mrb[72].mxu0 }
0x2097   :  { %v2439_v18 = vadd.f32 %v2438_v12, %v2395_v5  ;;  %v3068_v20 = vpop.f32.mrb[73].mxu0  ;;  %v3119_v12 = vld [vmem:[#allocation7] ss:$8 sps:$4 sm:$0xff]  }
0x2098   :  { %v2441_v21 = vpop.f32.mrb[74].mxu0  ;;  %v3158_v20 = vld [vmem:[#allocation7 + $0x10] ss:$8 sps:$4 sm:$0xff]  }
0x2099   :  { %v2445_v22 = vadd.f32 %v2439_v18, %v2330_v45  ;;  %v2442_v23 = vadd.f32 %v2441_v21, %v2395_v5  ;;  %v3069_v61 = vpop.f32.mrb[75].mxu0  ;;  %v2510_v21 = vrot.slane %v3903_v37, %v3491_v19 }
0x209b   :  { %v2446_v59 = vadd.f32 %v2442_v23, %v2331_v47  ;;  %v2447_v1 = vsel %vm165_vm2, %v2445_v22, 0.0  ;;  %v2455_v57 = vmul.f32 %v2445_v22, %v2445_v22 }
0x209c   :  { %2448 = vadd.xlane.f32.xlu0 %v2447_v1 }
0x209d   :  { %v2450_v17 = vsel %vm165_vm2, %v2446_v59, 0.0  ;;  %v2456_v62 = vmul.f32 %v2446_v59, %v2446_v59  ;;  %v2457_v24 = vsel %vm165_vm2, %v2455_v57, 0.0 }
0x209e   :  { %2451 = vadd.xlane.f32.xlu1 %v2450_v17 }
0x209f   :  { %v2460_v13 = vsel %vm165_vm2, %v2456_v62, 0.0 }
0x20a0   :  { %2458 = vadd.xlane.f32.xlu0 %v2457_v24 }
0x20a2   :  { %2461 = vadd.xlane.f32.xlu1 %v2460_v13 }
0x20b3   :  { %2518 = vrot.lane.b32.xlu1 %v3156_v11, %s3364_s3 }
0x20b6   :  { %2516 = vrot.lane.b32.xlu0 %v3235_v26, %s3364_s3 }
0x2129   :  { %v2449_v27 = vpop.xlane.xlu0 %2448 }
0x212a   :  { %v2453_v55 = vmul.f32 0.03125, %v2449_v27 }
0x212b   :  { %v2452_v56 = vpop.xlane.xlu1 %2451 }
0x212c   :  { %v2454_v29 = vmul.f32 0.03125, %v2452_v56  ;;  %v2465_v60 = vmul.f32 %v2453_v55, %v2453_v55  ;;  %v2469_v38 = vsub.f32 %v2445_v22, %v2453_v55 }
0x212d   :  { %v2459_v30 = vpop.xlane.xlu0 %2458 }
0x212e   :  { %v2463_v8 = vmul.f32 0.03125, %v2459_v30  ;;  %v2466_v32 = vmul.f32 %v2454_v29, %v2454_v29  ;;  %v2470_v6 = vsub.f32 %v2446_v59, %v2454_v29 }
0x212f   :  { %v2462_v31 = vpop.xlane.xlu1 %2461 }
0x2130   :  { %v2467_v33 = vsub.f32 %v2463_v8, %v2465_v60  ;;  %v2464_v34 = vmul.f32 0.03125, %v2462_v31 }
0x2131   :  { %v2517_v2 = vpop.permute.xlu0 %2516 }
0x2132   :  { %v2471_v15 = vadd.f32 1e-05, %v2467_v33  ;;  %v2468_v16 = vsub.f32 %v2464_v34, %v2466_v32  ;;  %3071 = vmatpush3.bf16.msra.mxu1 %v2517_v2 }
0x2133   :  { %3072 = vmatprep.subr.bf16.mxu1 %v3362_v0  ;;  %v2519_v35 = vpop.permute.xlu1 %2518 }
0x2134   :  { %3227 = vrsqrt.f32 %v2471_v15  ;;  %v2472_v36 = vadd.f32 1e-05, %v2468_v16 }
0x2136   :  { %3229 = vrsqrt.f32 %v2472_v36  ;;  %3073 = vmatpush3.bf16.msra.mxu1 %v2519_v35 }
0x2137   :  { %3078 = vmatprep.subr.bf16.mxu1 %v3362_v0 }
0x213e   :  { %v3228_v40 = vpop.eup %3227 }
0x213f   :  { %v2475_v7 = vmul.f32 %v3228_v40, %v2469_v38 }
0x2140   :  { %v3230_v42 = vpop.eup %3229 }
0x2141   :  { %v2481_v43 = vmul.f32 %v2480_v39, %v2475_v7  ;;  %v2476_v4 = vmul.f32 %v3230_v42, %v2470_v6 }
0x2143   :  { %v2487_v44 = vadd.f32 %v2486_v41, %v2481_v43  ;;  %v2482_v45 = vmul.f32 %v2480_v39, %v2476_v4  ;;  %v2596_v39 = vrot.slane %v3903_v37, %v3586_v14 }
0x2145   :  { %v2489_v47 = vsel %vm165_vm2, %v2487_v44, 0.0  ;;  %v2488_v50 = vadd.f32 %v2486_v41, %v2482_v45 }
0x2146   :  { %v2490_v51 = vrot.slane %v2489_v47, 4 }
0x2147   :  { %v2496_v46 = vsel %vm165_vm2, %v2488_v50, 0.0 }
0x2148   :  { %v2497_v52 = vrot.slane %v2496_v46, 4  ;;  %v2491_v54 = vadd.f32 %v2490_v51, %v2489_v47 }
0x214a   :  { %v2492_v48 = vrot.slane %v2491_v54, 2  ;;  %v2498_v28 = vadd.f32 %v2497_v52, %v2496_v46 }
0x214c   :  { %v2493_v25 = vadd.f32 %v2492_v48, %v2491_v54  ;;  %v2499_v53 = vrot.slane %v2498_v28, 2 }
0x214e   :  { %v2494_v9 = vrot.slane %v2493_v25, 1  ;;  %v2500_v58 = vadd.f32 %v2499_v53, %v2498_v28 }
0x2150   :  { %v2501_v49 = vrot.slane %v2500_v58, 1  ;;  %v2495_v10 = vadd.f32 %v2494_v9, %v2493_v25 }
0x2152   :  { %v2502_v63 = vadd.f32 %v2501_v49, %v2500_v58 }
0x2154   :  { %v2504_v3 = vsel %vm2503_vm5, %v2495_v10, %v2502_v63 }
0x2155   :  { %v2505_v5 = vmul.f32 0.125, %v2504_v3 }
0x2157   :  { %v2506_v18 = vpack.c.bf16 %v2505_v5, %v2505_v5 }
0x2159   :  { %3075 = vmatmul.mubr.msk.bf16.vlgmr.msra.gmra.mrb[72].mxu1 %vm165_vm2, %v2506_v18 }
0x215a   :  { %3079 = vmatpush3.bf16.msra.mxu1 %v3119_v12  ;;  %3082 = vmatprep.mubr.msk.bf16.mxu1 %vm3363_vm0, %v3362_v0 }
0x215b   :  { %3080 = vmatprep.subr.bf16.mxu1 %v3362_v0 }
0x215e   :  { %3081 = vmatpush3.bf16.msra.mxu1 %v3158_v20 }
0x222c   :  { %v2559_v22 = vpop.f32.mrb[72].mxu1 }
0x222d   :  { %v2560_v23 = vadd.f32 %v2559_v22, %v2510_v21  ;;  %v3076_v61 = vpop.f32.mrb[73].mxu1 }
0x222e   :  { %v2562_v59 = vpop.f32.mrb[74].mxu1 }
0x222f   :  { %v2565_v1 = vmul.f32 0.70710677, %v2560_v23  ;;  %v3077_v57 = vpop.f32.mrb[75].mxu1  ;;  %v2589_v16 = vmul.f32 0.5, %v2560_v23 }
0x2231   :  { %v2566_v17 = vand.u32 2147483647, %v2565_v1  ;;  %vm2586_vm6 = vcmp.ge.f32.partialorder %v2565_v1, 0.0 }
0x2233   :  { %v2567_v62 = vmul.f32 0.3275911, %v2566_v17  ;;  %v2580_v13 = vsub.f32 0.0, %v2566_v17 }
0x2235   :  { %v2568_v24 = vadd.f32 1.0, %v2567_v62  ;;  %v2581_v26 = vmul.f32 %v2580_v13, %v2566_v17 }
0x2237   :  { %3231 = vrcp.f32 %v2568_v24  ;;  %v2582_v0 = vmul.f32 1.442695, %v2581_v26 }
0x2239   :  { %3233 = vpow2.f32 %v2582_v0 }
0x2241   :  { %v3232_v11 = vpop.eup %3231 }
0x2242   :  { %v2571_v27 = vmul.f32 1.0614054, %v3232_v11 }
0x2243   :  { %v3234_v32 = vpop.eup %3233 }
0x2244   :  { %v2572_v55 = vadd.f32 -1.4531521, %v2571_v27 }
0x2246   :  { %v2573_v56 = vmul.f32 %v3232_v11, %v2572_v55 }
0x2248   :  { %v2574_v29 = vadd.f32 1.4214138, %v2573_v56 }
0x224a   :  { %v2575_v19 = vmul.f32 %v3232_v11, %v2574_v29 }
0x224c   :  { %v2576_v30 = vadd.f32 -0.28449672, %v2575_v19 }
0x224e   :  { %v2577_v60 = vmul.f32 %v3232_v11, %v2576_v30 }
0x2250   :  { %v2578_v8 = vadd.f32 0.2548296, %v2577_v60 }
0x2252   :  { %v2579_v31 = vmul.f32 %v3232_v11, %v2578_v8 }
0x2254   :  { %v2584_v33 = vmul.f32 %v3234_v32, %v2579_v31 }
0x2256   :  { %v2585_v34 = vsub.f32 1.0, %v2584_v33 }
0x2258   :  { %v2587_v2 = vsub.f32 0.0, %v2585_v34 }
0x225a   :  { %v2588_v15 = vsel %vm2586_vm6, %v2585_v34, %v2587_v2 }
0x225b   :  { %v2590_v35 = vadd.f32 1.0, %v2588_v15 }
0x225d   :  { %v2591_v36 = vmul.f32 %v2590_v35, %v2589_v16 }
0x225f   :  { %v2592_v38 = vpack.c.bf16 %v2591_v36, %v2591_v36 }
0x2261   :  { %3083 = vmatmul.mubr.msk.bf16.vlgmr.msra.gmra.mrb[76].mxu1 %vm165_vm2, %v2592_v38 }
0x2334   :  { %v2642_v40 = vpop.f32.mrb[76].mxu1 }
0x2335   :  { %v2643_v41 = vadd.f32 %v2642_v40, %v2596_v39  ;;  %v3084_v6 = vpop.f32.mrb[77].mxu1 }
0x2336   :  { %v2645_v7 = vpop.f32.mrb[78].mxu1 }
0x2337   :  { %v2649_v42 = vsel %vm2648_vm7, %v2643_v41, 0.0  ;;  %v3085_v43 = vpop.f32.mrb[79].mxu1 }
0x2338   :  { %2650 = vst [vmem:[#allocation10] sm:$0xff] %v2649_v42 }
0x2339   :  { %3335 = shalt.err (!%p3332_p8)
}
0x233a   :  { %s3336_s20 = scalar_lea.hbm %s3936_s4, 128 }
0x233b   :  { %p3337_p9 = scmp.ne.s32.totalorder %s3936_s4, %s3336_s20  ;;  %p3340_p10 = scmp.lt.u32.totalorder %s3336_s20, %s3936_s4 }
0x233d   :  { %p3342_p11 = pnand %p3340_p10, %p3337_p9 }
0x233f   :  { %3345 = shalt.err (!%p3342_p11)
}
0x2340   :  { %2660 = dma.vmem_to_hbm [thread:$0]  %s2658_s16, 128, %s3936_s4, [#allocation4]  }
0x2341   :  { %3352 = dma.done.wait [#allocation4], 128  }
0x2342   :  { %3353 = vsyncadd [#allocation4], 4294967168 }
0x2343   :  { %2664 = vsyncpa [#allocation3], 1 }
0x2344   :  { %2665 = vsyncpa [#allocation6], 1 }
0x2345   :  { %2666 = vsyncpa [#allocation9], 1 }
0x2346   :  { %2667 = vsyncpa [#allocation4], 1 }

</bundles_post_ra>
